<compile_context>
chip_gen: v7x
topology: tpu7x:2x2x1
jax: 0.10.0
libtpu: 0.0.40
codegen_flags: <defaults>
</compile_context>

<pallas_src>
import functools
import math

import jax
import jax.numpy as jnp
from jax import lax
from jax.experimental import pallas as pl
from jax.experimental.pallas import tpu as pltpu


def mha_kernel(q_ref, k_ref, v_ref, wq_ref, wk_ref, wv_ref, wo_ref, o_ref,
               qp_scr, kp_scr, vp_scr, m_scr, l_scr, acc_scr, *, h, d_k):
    """Grid = (batch, query-block, kv-block).

    The kv-block axis ("arbitrary", innermost) streams K/V with a flash-style
    online softmax; per-head running stats and the projected Q block live in
    VMEM scratch across kv steps.
    """
    ki = pl.program_id(2)
    n_kv = pl.num_programs(2)
    tq, D = qp_scr.shape
    tk = k_ref.shape[1]

    @pl.when(ki == 0)
    def _init():
        # Full-width Q projection (one N=D matmul -> good MXU fill), computed
        # once per (batch, query-block) and reused across every KV step.
        # 1/sqrt(d_k) is already folded into Wq on the host.
        qp_scr[...] = jnp.dot(
            q_ref[0], wq_ref[...], preferred_element_type=jnp.float32
        ).astype(qp_scr.dtype)
        m_scr[...] = jnp.full(m_scr.shape, -jnp.inf, m_scr.dtype)
        l_scr[...] = jnp.zeros_like(l_scr)
        acc_scr[...] = jnp.zeros_like(acc_scr)

    # Full-width K/V projections for the current KV block (bf16 operands,
    # f32 MXU accumulation). Stored in VMEM so the per-head loop reads small
    # (t, d_k) windows instead of keeping all heads live in vregs.
    # TODO(synk): pre-project K/V once at production sizes to avoid redoing
    #             this work for every query block.
    kp_scr[...] = jnp.dot(
        k_ref[0], wk_ref[...], preferred_element_type=jnp.float32
    ).astype(kp_scr.dtype)
    vp_scr[...] = jnp.dot(
        v_ref[0], wv_ref[...], preferred_element_type=jnp.float32
    ).astype(vp_scr.dtype)

    # Reference overwrites `mask` with ones -> masked_fill is a no-op, and
    # dropout p = 0.0 -> identity, so neither appears below.
    for hd in range(h):  # h is a small static constant; move heads onto a grid
                         # axis / lax.fori_loop(unroll=True) if h grows.
        off = hd * d_k
        qh = qp_scr[:, pl.ds(off, d_k)]          # (tq, d_k) bf16
        kh = kp_scr[:, pl.ds(off, d_k)]          # (tk, d_k) bf16
        vh = vp_scr[:, pl.ds(off, d_k)]          # (tk, d_k) bf16

        # scores = qh @ kh^T : contract the LAST dims -> no XLU transpose of kh.
        s = lax.dot_general(qh, kh, (((1,), (1,)), ((), ())),
                            preferred_element_type=jnp.float32)   # (tq, tk) f32

        # Online softmax; all statistics kept in f32.
        m_prev = m_scr[hd]                                         # (tq, 1)
        m_new = jnp.maximum(m_prev, jnp.max(s, axis=-1, keepdims=True))
        alpha = jnp.exp(m_prev - m_new)
        p = jnp.exp(s - m_new)
        l_scr[hd] = alpha * l_scr[hd] + jnp.sum(p, axis=-1, keepdims=True)
        acc_scr[hd] = alpha * acc_scr[hd] + jnp.dot(
            p.astype(jnp.bfloat16), vh, preferred_element_type=jnp.float32)
        m_scr[hd] = m_new

    @pl.when(ki == n_kv - 1)
    def _finalize():
        out = jnp.zeros((tq, D), jnp.float32)
        for hd in range(h):
            inv_l = pl.reciprocal(l_scr[hd], approx=False)   # exact: tq values only
            ctx = (acc_scr[hd] * inv_l).astype(jnp.bfloat16)  # (tq, d_k)
            # Fused output projection: sum_h ctx_h @ Wo[head]
            # -> no lane-level concatenation of the head outputs.
            out = out + jnp.dot(ctx, wo_ref[hd],
                                preferred_element_type=jnp.float32)
        o_ref[0] = out.astype(o_ref.dtype)


def multi_head_attention(q, k, v, wq_t, wk_t, wv_t, wo_t, *, h, mask=None,
                         tq_max=256, tk_max=512):
    """q/k/v: (B, S, D) float. w*_t: (D_in, D_out) = PyTorch weight transposed.

    `mask` is accepted for signature parity but ignored: the reference module
    overwrites it with torch.ones(...), so masked_fill_ is a no-op.
    """
    del mask
    B, S, D = q.shape
    assert D % h == 0, "d_model is not divisible by h"
    d_k = D // h

    tq = min(tq_max, S)
    tk = min(tk_max, S)
    assert S % tq == 0 and S % tk == 0, "S must be divisible by the tile sizes"

    # ---- host-side prep (one-time): bf16 operands, scale folded into Wq,
    #      per-head view of Wo^T for the fused output projection. ----
    scale = 1.0 / math.sqrt(d_k)
    wq_b = (wq_t * scale).astype(jnp.bfloat16)            # (D, D)
    wk_b = wk_t.astype(jnp.bfloat16)                      # (D, D)
    wv_b = wv_t.astype(jnp.bfloat16)                      # (D, D)
    wo_b = wo_t.reshape(h, d_k, D).astype(jnp.bfloat16)   # rows of Wo^T per head
    q_b = q.astype(jnp.bfloat16)                          # production inputs would
    k_b = k.astype(jnp.bfloat16)                          # already arrive in bf16
    v_b = v.astype(jnp.bfloat16)

    # ---- explicit scoped-VMEM budget: double-buffered blocks + scratch + slack.
    per_step_in = (tq * D + 2 * tk * D) * 2                     # bf16 q/k/v blocks
    weights = (3 * D * D + h * d_k * D) * 2                     # bf16, constant maps
    per_step_out = tq * D * 4                                   # f32 output block
    scratch = (tq * D + 2 * tk * D) * 2 + (2 * h * tq + h * tq * d_k) * 4
    vmem_limit = 2 * (per_step_in + weights + per_step_out) + scratch + (8 << 20)
    vmem_limit = int(min(max(vmem_limit, 32 << 20), 64 << 20))

    seq_q_spec = pl.BlockSpec((1, tq, D), lambda b, qi, ki: (b, qi, 0))
    seq_kv_spec = pl.BlockSpec((1, tk, D), lambda b, qi, ki: (b, ki, 0))
    w_spec = pl.BlockSpec((D, D), lambda b, qi, ki: (0, 0))          # fetched once
    wo_spec = pl.BlockSpec((h, d_k, D), lambda b, qi, ki: (0, 0, 0))  # fetched once
    out_spec = pl.BlockSpec((1, tq, D), lambda b, qi, ki: (b, qi, 0))

    return pl.pallas_call(
        functools.partial(mha_kernel, h=h, d_k=d_k),
        out_shape=jax.ShapeDtypeStruct((B, S, D), q.dtype),
        grid_spec=pltpu.PrefetchScalarGridSpec(
            num_scalar_prefetch=0,
            grid=(B, S // tq, S // tk),
            in_specs=[seq_q_spec, seq_kv_spec, seq_kv_spec,
                      w_spec, w_spec, w_spec, wo_spec],
            out_specs=out_spec,
            scratch_shapes=[
                pltpu.VMEM((tq, D), jnp.bfloat16),       # projected Q block
                pltpu.VMEM((tk, D), jnp.bfloat16),       # projected K block
                pltpu.VMEM((tk, D), jnp.bfloat16),       # projected V block
                pltpu.VMEM((h, tq, 1), jnp.float32),     # running row max
                pltpu.VMEM((h, tq, 1), jnp.float32),     # running denom
                pltpu.VMEM((h, tq, d_k), jnp.float32),   # running context
            ],
        ),
        compiler_params=pltpu.CompilerParams(
            dimension_semantics=("parallel", "parallel", "arbitrary"),
            vmem_limit_bytes=vmem_limit,
        ),
    )(q_b, k_b, v_b, wq_b, wk_b, wv_b, wo_b)


def reference_mha(q, k, v, wq_t, wk_t, wv_t, wo_t, *, h):
    """Pure-JAX f32 reference mirroring the PyTorch forward (mask no-op, dropout=0)."""
    B, S, D = q.shape
    d_k = D // h
    Q = (q @ wq_t).reshape(B, S, h, d_k).transpose(0, 2, 1, 3)
    K = (k @ wk_t).reshape(B, S, h, d_k).transpose(0, 2, 1, 3)
    V = (v @ wv_t).reshape(B, S, h, d_k).transpose(0, 2, 1, 3)
    scores = jnp.einsum("bhqd,bhkd->bhqk", Q, K) / math.sqrt(d_k)
    probs = jax.nn.softmax(scores, axis=-1)
    ctx = jnp.einsum("bhqk,bhkd->bhqd", probs, V)
    ctx = ctx.transpose(0, 2, 1, 3).reshape(B, S, D)
    return ctx @ wo_t


if __name__ == "__main__":
    # h must broadcast against the reference's hard-coded mask dim of 3 -> h = 3
    # (a reference artifact, not a kernel requirement); d_model = 48. dropout = 0.
    B, S, d_model, h = 2, 8, 48, 3

    key = jax.random.PRNGKey(0)
    kq, kk, kv, kwq, kwk, kwv, kwo = jax.random.split(key, 7)

    q = jax.random.normal(kq, (B, S, d_model), dtype=jnp.float32)
    k = jax.random.normal(kk, (B, S, d_model), dtype=jnp.float32)
    v = jax.random.normal(kv, (B, S, d_model), dtype=jnp.float32)

    # nn.Linear weights are (out, in); pre-transpose so the math is x @ W^T.
    bound = 1.0 / math.sqrt(d_model)

    def init_w(rng):
        w = jax.random.uniform(rng, (d_model, d_model), jnp.float32, -bound, bound)
        return w.T  # (in, out)

    wq_t, wk_t, wv_t, wo_t = init_w(kwq), init_w(kwk), init_w(kwv), init_w(kwo)

    out = multi_head_attention(q, k, v, wq_t, wk_t, wv_t, wo_t, h=h, mask=None)
    out = jax.block_until_ready(out)

    ref = reference_mha(q, k, v, wq_t, wk_t, wv_t, wo_t, h=h)
    assert out.shape == (B, S, d_model)
    # Tolerance covers bf16 matmul-operand rounding only: softmax statistics and
    # all accumulation are f32, and the softmax reciprocal is exact (not approx).
    max_err = float(jnp.max(jnp.abs(out - ref)))
    assert jnp.allclose(out, ref, atol=2e-2, rtol=2e-2), (
        f"mismatch vs reference, max abs err = {max_err}")

    print("KERNEL_OK")
</pallas_src>

<mosaic_0001>
module attributes {stable_mosaic.version = 11 : i64} {
  func.func @mha_kernel(%arg0: i32, %arg1: i32, %arg2: i32, %arg3: memref<1x8x48xbf16, #tpu.memory_space<vmem>>, %arg4: memref<1x8x48xbf16, #tpu.memory_space<vmem>>, %arg5: memref<1x8x48xbf16, #tpu.memory_space<vmem>>, %arg6: memref<48x48xbf16, #tpu.memory_space<vmem>>, %arg7: memref<48x48xbf16, #tpu.memory_space<vmem>>, %arg8: memref<48x48xbf16, #tpu.memory_space<vmem>>, %arg9: memref<3x16x48xbf16, #tpu.memory_space<vmem>>, %arg10: memref<1x8x48xf32, #tpu.memory_space<vmem>>, %arg11: memref<8x48xbf16, #tpu.memory_space<vmem>>, %arg12: memref<8x48xbf16, #tpu.memory_space<vmem>>, %arg13: memref<8x48xbf16, #tpu.memory_space<vmem>>, %arg14: memref<3x8x1xf32, #tpu.memory_space<vmem>>, %arg15: memref<3x8x1xf32, #tpu.memory_space<vmem>>, %arg16: memref<3x8x16xf32, #tpu.memory_space<vmem>>) attributes {dimension_semantics = [#tpu.dimension_semantics<parallel>, #tpu.dimension_semantics<parallel>, #tpu.dimension_semantics<arbitrary>], iteration_bounds = array<i64: 2, 1, 1>, scalar_prefetch = 0 : i64, scratch_operands = 6 : i64, tpu.core_type = #tpu.core_type<tc>, window_params = [{transform_indices = @transform_0, window_bounds = array<i64: 1, 8, 48>}, {transform_indices = @transform_1, window_bounds = array<i64: 1, 8, 48>}, {transform_indices = @transform_2, window_bounds = array<i64: 1, 8, 48>}, {pipeline_mode = #tpu.pipeline_mode<synchronous>, transform_indices = @transform_3, window_bounds = array<i64: 48, 48>}, {pipeline_mode = #tpu.pipeline_mode<synchronous>, transform_indices = @transform_4, window_bounds = array<i64: 48, 48>}, {pipeline_mode = #tpu.pipeline_mode<synchronous>, transform_indices = @transform_5, window_bounds = array<i64: 48, 48>}, {pipeline_mode = #tpu.pipeline_mode<synchronous>, transform_indices = @transform_6, window_bounds = array<i64: 3, 16, 48>}, {transform_indices = @transform_7, window_bounds = array<i64: 1, 8, 48>}]} {
    %c0_i32 = arith.constant 0 : i32
    %0 = arith.cmpi eq, %arg2, %c0_i32 : i32
    %1 = arith.extui %0 : i1 to i32
    %c0_i32_0 = arith.constant 0 : i32
    %2 = arith.cmpi ne, %1, %c0_i32_0 : i32
    scf.if %2 {
      %c0_97 = arith.constant 0 : index
      %c0_98 = arith.constant 0 : index
      %c0_99 = arith.constant 0 : index
      %126 = vector.load %arg3[%c0_97, %c0_98, %c0_99] : memref<1x8x48xbf16, #tpu.memory_space<vmem>>, vector<1x8x48xbf16>
      %127 = vector.shape_cast %126 : vector<1x8x48xbf16> to vector<8x48xbf16>
      %c0_100 = arith.constant 0 : index
      %c0_101 = arith.constant 0 : index
      %128 = vector.load %arg6[%c0_100, %c0_101] : memref<48x48xbf16, #tpu.memory_space<vmem>>, vector<48x48xbf16>
      %cst_102 = arith.constant dense<0.000000e+00> : vector<8x48xf32>
      %129 = tpu.matmul %127, %128, %cst_102 {dimension_numbers = #tpu.dot_dimension_numbers<[1], [0], [0], [1], [0, 0, 1, 1], [], []>} : vector<8x48xbf16>, vector<48x48xbf16>, vector<8x48xf32> -> vector<8x48xf32>
      %130 = arith.truncf %129 : vector<8x48xf32> to vector<8x48xbf16>
      %c0_103 = arith.constant 0 : index
      %c0_104 = arith.constant 0 : index
      %131 = vector.load %arg11[%c0_103, %c0_104] : memref<8x48xbf16, #tpu.memory_space<vmem>>, vector<8x48xbf16>
      tpu.vector_store %arg11[%c0_103, %c0_104], %130 {strides = array<i32>} : memref<8x48xbf16, #tpu.memory_space<vmem>>, vector<8x48xbf16>,
      %cst_105 = arith.constant 0xFF800000 : f32
      %132 = vector.broadcast %cst_105 : f32 to vector<3x8x1xf32>
      %c0_106 = arith.constant 0 : index
      %c0_107 = arith.constant 0 : index
      %c0_108 = arith.constant 0 : index
      %133 = vector.load %arg14[%c0_106, %c0_107, %c0_108] : memref<3x8x1xf32, #tpu.memory_space<vmem>>, vector<3x8x1xf32>
      tpu.vector_store %arg14[%c0_106, %c0_107, %c0_108], %132 {strides = array<i32>} : memref<3x8x1xf32, #tpu.memory_space<vmem>>, vector<3x8x1xf32>,
      %cst_109 = arith.constant 0.000000e+00 : f32
      %134 = vector.broadcast %cst_109 : f32 to vector<3x8x1xf32>
      %c0_110 = arith.constant 0 : index
      %c0_111 = arith.constant 0 : index
      %c0_112 = arith.constant 0 : index
      %135 = vector.load %arg15[%c0_110, %c0_111, %c0_112] : memref<3x8x1xf32, #tpu.memory_space<vmem>>, vector<3x8x1xf32>
      tpu.vector_store %arg15[%c0_110, %c0_111, %c0_112], %134 {strides = array<i32>} : memref<3x8x1xf32, #tpu.memory_space<vmem>>, vector<3x8x1xf32>,
      %cst_113 = arith.constant 0.000000e+00 : f32
      %136 = vector.broadcast %cst_113 : f32 to vector<3x8x16xf32>
      %c0_114 = arith.constant 0 : index
      %c0_115 = arith.constant 0 : index
      %c0_116 = arith.constant 0 : index
      %137 = vector.load %arg16[%c0_114, %c0_115, %c0_116] : memref<3x8x16xf32, #tpu.memory_space<vmem>>, vector<3x8x16xf32>
      tpu.vector_store %arg16[%c0_114, %c0_115, %c0_116], %136 {strides = array<i32>} : memref<3x8x16xf32, #tpu.memory_space<vmem>>, vector<3x8x16xf32>,
    } else {
    }
    %c0 = arith.constant 0 : index
    %c0_1 = arith.constant 0 : index
    %c0_2 = arith.constant 0 : index
    %3 = vector.load %arg4[%c0, %c0_1, %c0_2] : memref<1x8x48xbf16, #tpu.memory_space<vmem>>, vector<1x8x48xbf16>
    %4 = vector.shape_cast %3 : vector<1x8x48xbf16> to vector<8x48xbf16>
    %c0_3 = arith.constant 0 : index
    %c0_4 = arith.constant 0 : index
    %5 = vector.load %arg7[%c0_3, %c0_4] : memref<48x48xbf16, #tpu.memory_space<vmem>>, vector<48x48xbf16>
    %cst = arith.constant dense<0.000000e+00> : vector<8x48xf32>
    %6 = tpu.matmul %4, %5, %cst {dimension_numbers = #tpu.dot_dimension_numbers<[1], [0], [0], [1], [0, 0, 1, 1], [], []>} : vector<8x48xbf16>, vector<48x48xbf16>, vector<8x48xf32> -> vector<8x48xf32>
    %7 = arith.truncf %6 : vector<8x48xf32> to vector<8x48xbf16>
    %c0_5 = arith.constant 0 : index
    %c0_6 = arith.constant 0 : index
    %8 = vector.load %arg12[%c0_5, %c0_6] : memref<8x48xbf16, #tpu.memory_space<vmem>>, vector<8x48xbf16>
    tpu.vector_store %arg12[%c0_5, %c0_6], %7 {strides = array<i32>} : memref<8x48xbf16, #tpu.memory_space<vmem>>, vector<8x48xbf16>,
    %c0_7 = arith.constant 0 : index
    %c0_8 = arith.constant 0 : index
    %c0_9 = arith.constant 0 : index
    %9 = vector.load %arg5[%c0_7, %c0_8, %c0_9] : memref<1x8x48xbf16, #tpu.memory_space<vmem>>, vector<1x8x48xbf16>
    %10 = vector.shape_cast %9 : vector<1x8x48xbf16> to vector<8x48xbf16>
    %c0_10 = arith.constant 0 : index
    %c0_11 = arith.constant 0 : index
    %11 = vector.load %arg8[%c0_10, %c0_11] : memref<48x48xbf16, #tpu.memory_space<vmem>>, vector<48x48xbf16>
    %cst_12 = arith.constant dense<0.000000e+00> : vector<8x48xf32>
    %12 = tpu.matmul %10, %11, %cst_12 {dimension_numbers = #tpu.dot_dimension_numbers<[1], [0], [0], [1], [0, 0, 1, 1], [], []>} : vector<8x48xbf16>, vector<48x48xbf16>, vector<8x48xf32> -> vector<8x48xf32>
    %13 = arith.truncf %12 : vector<8x48xf32> to vector<8x48xbf16>
    %c0_13 = arith.constant 0 : index
    %c0_14 = arith.constant 0 : index
    %14 = vector.load %arg13[%c0_13, %c0_14] : memref<8x48xbf16, #tpu.memory_space<vmem>>, vector<8x48xbf16>
    tpu.vector_store %arg13[%c0_13, %c0_14], %13 {strides = array<i32>} : memref<8x48xbf16, #tpu.memory_space<vmem>>, vector<8x48xbf16>,
    %c0_15 = arith.constant 0 : index
    %c0_16 = arith.constant 0 : index
    %15 = vector.load %arg11[%c0_15, %c0_16] : memref<8x48xbf16, #tpu.memory_space<vmem>>, vector<8x16xbf16>
    %c0_17 = arith.constant 0 : index
    %c0_18 = arith.constant 0 : index
    %16 = vector.load %arg12[%c0_17, %c0_18] : memref<8x48xbf16, #tpu.memory_space<vmem>>, vector<8x16xbf16>
    %c0_19 = arith.constant 0 : index
    %c0_20 = arith.constant 0 : index
    %17 = vector.load %arg13[%c0_19, %c0_20] : memref<8x48xbf16, #tpu.memory_space<vmem>>, vector<8x16xbf16>
    %cst_21 = arith.constant dense<0.000000e+00> : vector<8x8xf32>
    %18 = tpu.matmul %15, %16, %cst_21 {dimension_numbers = #tpu.dot_dimension_numbers<[1], [1], [0], [0], [0, 0, 1, 0], [], []>} : vector<8x16xbf16>, vector<8x16xbf16>, vector<8x8xf32> -> vector<8x8xf32>
    %c0_22 = arith.constant 0 : index
    %c0_23 = arith.constant 0 : index
    %c0_24 = arith.constant 0 : index
    %19 = vector.load %arg14[%c0_22, %c0_23, %c0_24] : memref<3x8x1xf32, #tpu.memory_space<vmem>>, vector<1x8x1xf32>
    %20 = vector.shape_cast %19 : vector<1x8x1xf32> to vector<8x1xf32>
    %cst_25 = arith.constant dense<0xFF800000> : vector<8xf32>
    %21 = vector.multi_reduction <maximumf>, %18, %cst_25 [1] : vector<8x8xf32> to vector<8xf32>
    %22 = vector.shape_cast %21 : vector<8xf32> to vector<8x1xf32>
    %23 = arith.maximumf %20, %22 : vector<8x1xf32>
    %24 = arith.subf %20, %23 : vector<8x1xf32>
    %25 = math.exp %24 : vector<8x1xf32>
    %26 = vector.broadcast %23 : vector<8x1xf32> to vector<8x8xf32>
    %27 = arith.subf %18, %26 : vector<8x8xf32>
    %28 = math.exp %27 : vector<8x8xf32>
    %c0_26 = arith.constant 0 : index
    %c0_27 = arith.constant 0 : index
    %c0_28 = arith.constant 0 : index
    %29 = vector.load %arg15[%c0_26, %c0_27, %c0_28] : memref<3x8x1xf32, #tpu.memory_space<vmem>>, vector<1x8x1xf32>
    %30 = vector.shape_cast %29 : vector<1x8x1xf32> to vector<8x1xf32>
    %31 = arith.mulf %25, %30 : vector<8x1xf32>
    %cst_29 = arith.constant dense<0.000000e+00> : vector<8xf32>
    %32 = vector.multi_reduction <add>, %28, %cst_29 [1] : vector<8x8xf32> to vector<8xf32>
    %33 = vector.shape_cast %32 : vector<8xf32> to vector<8x1xf32>
    %34 = arith.addf %31, %33 : vector<8x1xf32>
    %c0_30 = arith.constant 0 : index
    %c0_31 = arith.constant 0 : index
    %c0_32 = arith.constant 0 : index
    %35 = vector.load %arg15[%c0_30, %c0_31, %c0_32] : memref<3x8x1xf32, #tpu.memory_space<vmem>>, vector<1x8x1xf32>
    %36 = vector.shape_cast %35 : vector<1x8x1xf32> to vector<8x1xf32>
    %37 = vector.shape_cast %34 : vector<8x1xf32> to vector<1x8x1xf32>
    tpu.vector_store %arg15[%c0_30, %c0_31, %c0_32], %37 {strides = array<i32>} : memref<3x8x1xf32, #tpu.memory_space<vmem>>, vector<1x8x1xf32>,
    %c0_33 = arith.constant 0 : index
    %c0_34 = arith.constant 0 : index
    %c0_35 = arith.constant 0 : index
    %38 = vector.load %arg16[%c0_33, %c0_34, %c0_35] : memref<3x8x16xf32, #tpu.memory_space<vmem>>, vector<1x8x16xf32>
    %39 = vector.shape_cast %38 : vector<1x8x16xf32> to vector<8x16xf32>
    %40 = vector.broadcast %25 : vector<8x1xf32> to vector<8x16xf32>
    %41 = arith.mulf %40, %39 : vector<8x16xf32>
    %42 = arith.truncf %28 : vector<8x8xf32> to vector<8x8xbf16>
    %cst_36 = arith.constant dense<0.000000e+00> : vector<8x16xf32>
    %43 = tpu.matmul %42, %17, %cst_36 {dimension_numbers = #tpu.dot_dimension_numbers<[1], [0], [0], [1], [0, 0, 1, 1], [], []>} : vector<8x8xbf16>, vector<8x16xbf16>, vector<8x16xf32> -> vector<8x16xf32>
    %44 = arith.addf %41, %43 : vector<8x16xf32>
    %c0_37 = arith.constant 0 : index
    %c0_38 = arith.constant 0 : index
    %c0_39 = arith.constant 0 : index
    %45 = vector.load %arg16[%c0_37, %c0_38, %c0_39] : memref<3x8x16xf32, #tpu.memory_space<vmem>>, vector<1x8x16xf32>
    %46 = vector.shape_cast %45 : vector<1x8x16xf32> to vector<8x16xf32>
    %47 = vector.shape_cast %44 : vector<8x16xf32> to vector<1x8x16xf32>
    tpu.vector_store %arg16[%c0_37, %c0_38, %c0_39], %47 {strides = array<i32>} : memref<3x8x16xf32, #tpu.memory_space<vmem>>, vector<1x8x16xf32>,
    %c0_40 = arith.constant 0 : index
    %c0_41 = arith.constant 0 : index
    %c0_42 = arith.constant 0 : index
    %48 = vector.load %arg14[%c0_40, %c0_41, %c0_42] : memref<3x8x1xf32, #tpu.memory_space<vmem>>, vector<1x8x1xf32>
    %49 = vector.shape_cast %48 : vector<1x8x1xf32> to vector<8x1xf32>
    %50 = vector.shape_cast %23 : vector<8x1xf32> to vector<1x8x1xf32>
    tpu.vector_store %arg14[%c0_40, %c0_41, %c0_42], %50 {strides = array<i32>} : memref<3x8x1xf32, #tpu.memory_space<vmem>>, vector<1x8x1xf32>,
    %c0_43 = arith.constant 0 : index
    %c16 = arith.constant 16 : index
    %51 = vector.load %arg11[%c0_43, %c16] : memref<8x48xbf16, #tpu.memory_space<vmem>>, vector<8x16xbf16>
    %c0_44 = arith.constant 0 : index
    %c16_45 = arith.constant 16 : index
    %52 = vector.load %arg12[%c0_44, %c16_45] : memref<8x48xbf16, #tpu.memory_space<vmem>>, vector<8x16xbf16>
    %c0_46 = arith.constant 0 : index
    %c16_47 = arith.constant 16 : index
    %53 = vector.load %arg13[%c0_46, %c16_47] : memref<8x48xbf16, #tpu.memory_space<vmem>>, vector<8x16xbf16>
    %cst_48 = arith.constant dense<0.000000e+00> : vector<8x8xf32>
    %54 = tpu.matmul %51, %52, %cst_48 {dimension_numbers = #tpu.dot_dimension_numbers<[1], [1], [0], [0], [0, 0, 1, 0], [], []>} : vector<8x16xbf16>, vector<8x16xbf16>, vector<8x8xf32> -> vector<8x8xf32>
    %c1 = arith.constant 1 : index
    %c0_49 = arith.constant 0 : index
    %c0_50 = arith.constant 0 : index
    %55 = vector.load %arg14[%c1, %c0_49, %c0_50] : memref<3x8x1xf32, #tpu.memory_space<vmem>>, vector<1x8x1xf32>
    %56 = vector.shape_cast %55 : vector<1x8x1xf32> to vector<8x1xf32>
    %cst_51 = arith.constant dense<0xFF800000> : vector<8xf32>
    %57 = vector.multi_reduction <maximumf>, %54, %cst_51 [1] : vector<8x8xf32> to vector<8xf32>
    %58 = vector.shape_cast %57 : vector<8xf32> to vector<8x1xf32>
    %59 = arith.maximumf %56, %58 : vector<8x1xf32>
    %60 = arith.subf %56, %59 : vector<8x1xf32>
    %61 = math.exp %60 : vector<8x1xf32>
    %62 = vector.broadcast %59 : vector<8x1xf32> to vector<8x8xf32>
    %63 = arith.subf %54, %62 : vector<8x8xf32>
    %64 = math.exp %63 : vector<8x8xf32>
    %c1_52 = arith.constant 1 : index
    %c0_53 = arith.constant 0 : index
    %c0_54 = arith.constant 0 : index
    %65 = vector.load %arg15[%c1_52, %c0_53, %c0_54] : memref<3x8x1xf32, #tpu.memory_space<vmem>>, vector<1x8x1xf32>
    %66 = vector.shape_cast %65 : vector<1x8x1xf32> to vector<8x1xf32>
    %67 = arith.mulf %61, %66 : vector<8x1xf32>
    %cst_55 = arith.constant dense<0.000000e+00> : vector<8xf32>
    %68 = vector.multi_reduction <add>, %64, %cst_55 [1] : vector<8x8xf32> to vector<8xf32>
    %69 = vector.shape_cast %68 : vector<8xf32> to vector<8x1xf32>
    %70 = arith.addf %67, %69 : vector<8x1xf32>
    %c1_56 = arith.constant 1 : index
    %c0_57 = arith.constant 0 : index
    %c0_58 = arith.constant 0 : index
    %71 = vector.load %arg15[%c1_56, %c0_57, %c0_58] : memref<3x8x1xf32, #tpu.memory_space<vmem>>, vector<1x8x1xf32>
    %72 = vector.shape_cast %71 : vector<1x8x1xf32> to vector<8x1xf32>
    %73 = vector.shape_cast %70 : vector<8x1xf32> to vector<1x8x1xf32>
    tpu.vector_store %arg15[%c1_56, %c0_57, %c0_58], %73 {strides = array<i32>} : memref<3x8x1xf32, #tpu.memory_space<vmem>>, vector<1x8x1xf32>,
    %c1_59 = arith.constant 1 : index
    %c0_60 = arith.constant 0 : index
    %c0_61 = arith.constant 0 : index
    %74 = vector.load %arg16[%c1_59, %c0_60, %c0_61] : memref<3x8x16xf32, #tpu.memory_space<vmem>>, vector<1x8x16xf32>
    %75 = vector.shape_cast %74 : vector<1x8x16xf32> to vector<8x16xf32>
    %76 = vector.broadcast %61 : vector<8x1xf32> to vector<8x16xf32>
    %77 = arith.mulf %76, %75 : vector<8x16xf32>
    %78 = arith.truncf %64 : vector<8x8xf32> to vector<8x8xbf16>
    %cst_62 = arith.constant dense<0.000000e+00> : vector<8x16xf32>
    %79 = tpu.matmul %78, %53, %cst_62 {dimension_numbers = #tpu.dot_dimension_numbers<[1], [0], [0], [1], [0, 0, 1, 1], [], []>} : vector<8x8xbf16>, vector<8x16xbf16>, vector<8x16xf32> -> vector<8x16xf32>
    %80 = arith.addf %77, %79 : vector<8x16xf32>
    %c1_63 = arith.constant 1 : index
    %c0_64 = arith.constant 0 : index
    %c0_65 = arith.constant 0 : index
    %81 = vector.load %arg16[%c1_63, %c0_64, %c0_65] : memref<3x8x16xf32, #tpu.memory_space<vmem>>, vector<1x8x16xf32>
    %82 = vector.shape_cast %81 : vector<1x8x16xf32> to vector<8x16xf32>
    %83 = vector.shape_cast %80 : vector<8x16xf32> to vector<1x8x16xf32>
    tpu.vector_store %arg16[%c1_63, %c0_64, %c0_65], %83 {strides = array<i32>} : memref<3x8x16xf32, #tpu.memory_space<vmem>>, vector<1x8x16xf32>,
    %c1_66 = arith.constant 1 : index
    %c0_67 = arith.constant 0 : index
    %c0_68 = arith.constant 0 : index
    %84 = vector.load %arg14[%c1_66, %c0_67, %c0_68] : memref<3x8x1xf32, #tpu.memory_space<vmem>>, vector<1x8x1xf32>
    %85 = vector.shape_cast %84 : vector<1x8x1xf32> to vector<8x1xf32>
    %86 = vector.shape_cast %59 : vector<8x1xf32> to vector<1x8x1xf32>
    tpu.vector_store %arg14[%c1_66, %c0_67, %c0_68], %86 {strides = array<i32>} : memref<3x8x1xf32, #tpu.memory_space<vmem>>, vector<1x8x1xf32>,
    %c0_69 = arith.constant 0 : index
    %c32 = arith.constant 32 : index
    %87 = vector.load %arg11[%c0_69, %c32] : memref<8x48xbf16, #tpu.memory_space<vmem>>, vector<8x16xbf16>
    %c0_70 = arith.constant 0 : index
    %c32_71 = arith.constant 32 : index
    %88 = vector.load %arg12[%c0_70, %c32_71] : memref<8x48xbf16, #tpu.memory_space<vmem>>, vector<8x16xbf16>
    %c0_72 = arith.constant 0 : index
    %c32_73 = arith.constant 32 : index
    %89 = vector.load %arg13[%c0_72, %c32_73] : memref<8x48xbf16, #tpu.memory_space<vmem>>, vector<8x16xbf16>
    %cst_74 = arith.constant dense<0.000000e+00> : vector<8x8xf32>
    %90 = tpu.matmul %87, %88, %cst_74 {dimension_numbers = #tpu.dot_dimension_numbers<[1], [1], [0], [0], [0, 0, 1, 0], [], []>} : vector<8x16xbf16>, vector<8x16xbf16>, vector<8x8xf32> -> vector<8x8xf32>
    %c2 = arith.constant 2 : index
    %c0_75 = arith.constant 0 : index
    %c0_76 = arith.constant 0 : index
    %91 = vector.load %arg14[%c2, %c0_75, %c0_76] : memref<3x8x1xf32, #tpu.memory_space<vmem>>, vector<1x8x1xf32>
    %92 = vector.shape_cast %91 : vector<1x8x1xf32> to vector<8x1xf32>
    %cst_77 = arith.constant dense<0xFF800000> : vector<8xf32>
    %93 = vector.multi_reduction <maximumf>, %90, %cst_77 [1] : vector<8x8xf32> to vector<8xf32>
    %94 = vector.shape_cast %93 : vector<8xf32> to vector<8x1xf32>
    %95 = arith.maximumf %92, %94 : vector<8x1xf32>
    %96 = arith.subf %92, %95 : vector<8x1xf32>
    %97 = math.exp %96 : vector<8x1xf32>
    %98 = vector.broadcast %95 : vector<8x1xf32> to vector<8x8xf32>
    %99 = arith.subf %90, %98 : vector<8x8xf32>
    %100 = math.exp %99 : vector<8x8xf32>
    %c2_78 = arith.constant 2 : index
    %c0_79 = arith.constant 0 : index
    %c0_80 = arith.constant 0 : index
    %101 = vector.load %arg15[%c2_78, %c0_79, %c0_80] : memref<3x8x1xf32, #tpu.memory_space<vmem>>, vector<1x8x1xf32>
    %102 = vector.shape_cast %101 : vector<1x8x1xf32> to vector<8x1xf32>
    %103 = arith.mulf %97, %102 : vector<8x1xf32>
    %cst_81 = arith.constant dense<0.000000e+00> : vector<8xf32>
    %104 = vector.multi_reduction <add>, %100, %cst_81 [1] : vector<8x8xf32> to vector<8xf32>
    %105 = vector.shape_cast %104 : vector<8xf32> to vector<8x1xf32>
    %106 = arith.addf %103, %105 : vector<8x1xf32>
    %c2_82 = arith.constant 2 : index
    %c0_83 = arith.constant 0 : index
    %c0_84 = arith.constant 0 : index
    %107 = vector.load %arg15[%c2_82, %c0_83, %c0_84] : memref<3x8x1xf32, #tpu.memory_space<vmem>>, vector<1x8x1xf32>
    %108 = vector.shape_cast %107 : vector<1x8x1xf32> to vector<8x1xf32>
    %109 = vector.shape_cast %106 : vector<8x1xf32> to vector<1x8x1xf32>
    tpu.vector_store %arg15[%c2_82, %c0_83, %c0_84], %109 {strides = array<i32>} : memref<3x8x1xf32, #tpu.memory_space<vmem>>, vector<1x8x1xf32>,
    %c2_85 = arith.constant 2 : index
    %c0_86 = arith.constant 0 : index
    %c0_87 = arith.constant 0 : index
    %110 = vector.load %arg16[%c2_85, %c0_86, %c0_87] : memref<3x8x16xf32, #tpu.memory_space<vmem>>, vector<1x8x16xf32>
    %111 = vector.shape_cast %110 : vector<1x8x16xf32> to vector<8x16xf32>
    %112 = vector.broadcast %97 : vector<8x1xf32> to vector<8x16xf32>
    %113 = arith.mulf %112, %111 : vector<8x16xf32>
    %114 = arith.truncf %100 : vector<8x8xf32> to vector<8x8xbf16>
    %cst_88 = arith.constant dense<0.000000e+00> : vector<8x16xf32>
    %115 = tpu.matmul %114, %89, %cst_88 {dimension_numbers = #tpu.dot_dimension_numbers<[1], [0], [0], [1], [0, 0, 1, 1], [], []>} : vector<8x8xbf16>, vector<8x16xbf16>, vector<8x16xf32> -> vector<8x16xf32>
    %116 = arith.addf %113, %115 : vector<8x16xf32>
    %c2_89 = arith.constant 2 : index
    %c0_90 = arith.constant 0 : index
    %c0_91 = arith.constant 0 : index
    %117 = vector.load %arg16[%c2_89, %c0_90, %c0_91] : memref<3x8x16xf32, #tpu.memory_space<vmem>>, vector<1x8x16xf32>
    %118 = vector.shape_cast %117 : vector<1x8x16xf32> to vector<8x16xf32>
    %119 = vector.shape_cast %116 : vector<8x16xf32> to vector<1x8x16xf32>
    tpu.vector_store %arg16[%c2_89, %c0_90, %c0_91], %119 {strides = array<i32>} : memref<3x8x16xf32, #tpu.memory_space<vmem>>, vector<1x8x16xf32>,
    %c2_92 = arith.constant 2 : index
    %c0_93 = arith.constant 0 : index
    %c0_94 = arith.constant 0 : index
    %120 = vector.load %arg14[%c2_92, %c0_93, %c0_94] : memref<3x8x1xf32, #tpu.memory_space<vmem>>, vector<1x8x1xf32>
    %121 = vector.shape_cast %120 : vector<1x8x1xf32> to vector<8x1xf32>
    %122 = vector.shape_cast %95 : vector<8x1xf32> to vector<1x8x1xf32>
    tpu.vector_store %arg14[%c2_92, %c0_93, %c0_94], %122 {strides = array<i32>} : memref<3x8x1xf32, #tpu.memory_space<vmem>>, vector<1x8x1xf32>,
    %c0_i32_95 = arith.constant 0 : i32
    %123 = arith.cmpi eq, %arg2, %c0_i32_95 : i32
    %124 = arith.extui %123 : i1 to i32
    %c0_i32_96 = arith.constant 0 : i32
    %125 = arith.cmpi ne, %124, %c0_i32_96 : i32
    scf.if %125 {
      %cst_97 = arith.constant 0.000000e+00 : f32
      %126 = vector.broadcast %cst_97 : f32 to vector<8x48xf32>
      %c0_98 = arith.constant 0 : index
      %c0_99 = arith.constant 0 : index
      %c0_100 = arith.constant 0 : index
      %127 = vector.load %arg15[%c0_98, %c0_99, %c0_100] : memref<3x8x1xf32, #tpu.memory_space<vmem>>, vector<1x8x1xf32>
      %128 = vector.shape_cast %127 : vector<1x8x1xf32> to vector<8x1xf32>
      %129 = tpu.reciprocal %128 : vector<8x1xf32> -> vector<8x1xf32>
      %c0_101 = arith.constant 0 : index
      %c0_102 = arith.constant 0 : index
      %c0_103 = arith.constant 0 : index
      %130 = vector.load %arg16[%c0_101, %c0_102, %c0_103] : memref<3x8x16xf32, #tpu.memory_space<vmem>>, vector<1x8x16xf32>
      %131 = vector.shape_cast %130 : vector<1x8x16xf32> to vector<8x16xf32>
      %132 = vector.broadcast %129 : vector<8x1xf32> to vector<8x16xf32>
      %133 = arith.mulf %131, %132 : vector<8x16xf32>
      %134 = arith.truncf %133 : vector<8x16xf32> to vector<8x16xbf16>
      %c0_104 = arith.constant 0 : index
      %c0_105 = arith.constant 0 : index
      %c0_106 = arith.constant 0 : index
      %135 = vector.load %arg9[%c0_104, %c0_105, %c0_106] : memref<3x16x48xbf16, #tpu.memory_space<vmem>>, vector<1x16x48xbf16>
      %136 = vector.shape_cast %135 : vector<1x16x48xbf16> to vector<16x48xbf16>
      %cst_107 = arith.constant dense<0.000000e+00> : vector<8x48xf32>
      %137 = tpu.matmul %134, %136, %cst_107 {dimension_numbers = #tpu.dot_dimension_numbers<[1], [0], [0], [1], [0, 0, 1, 1], [], []>} : vector<8x16xbf16>, vector<16x48xbf16>, vector<8x48xf32> -> vector<8x48xf32>
      %138 = arith.addf %126, %137 : vector<8x48xf32>
      %c1_108 = arith.constant 1 : index
      %c0_109 = arith.constant 0 : index
      %c0_110 = arith.constant 0 : index
      %139 = vector.load %arg15[%c1_108, %c0_109, %c0_110] : memref<3x8x1xf32, #tpu.memory_space<vmem>>, vector<1x8x1xf32>
      %140 = vector.shape_cast %139 : vector<1x8x1xf32> to vector<8x1xf32>
      %141 = tpu.reciprocal %140 : vector<8x1xf32> -> vector<8x1xf32>
      %c1_111 = arith.constant 1 : index
      %c0_112 = arith.constant 0 : index
      %c0_113 = arith.constant 0 : index
      %142 = vector.load %arg16[%c1_111, %c0_112, %c0_113] : memref<3x8x16xf32, #tpu.memory_space<vmem>>, vector<1x8x16xf32>
      %143 = vector.shape_cast %142 : vector<1x8x16xf32> to vector<8x16xf32>
      %144 = vector.broadcast %141 : vector<8x1xf32> to vector<8x16xf32>
      %145 = arith.mulf %143, %144 : vector<8x16xf32>
      %146 = arith.truncf %145 : vector<8x16xf32> to vector<8x16xbf16>
      %c1_114 = arith.constant 1 : index
      %c0_115 = arith.constant 0 : index
      %c0_116 = arith.constant 0 : index
      %147 = vector.load %arg9[%c1_114, %c0_115, %c0_116] : memref<3x16x48xbf16, #tpu.memory_space<vmem>>, vector<1x16x48xbf16>
      %148 = vector.shape_cast %147 : vector<1x16x48xbf16> to vector<16x48xbf16>
      %cst_117 = arith.constant dense<0.000000e+00> : vector<8x48xf32>
      %149 = tpu.matmul %146, %148, %cst_117 {dimension_numbers = #tpu.dot_dimension_numbers<[1], [0], [0], [1], [0, 0, 1, 1], [], []>} : vector<8x16xbf16>, vector<16x48xbf16>, vector<8x48xf32> -> vector<8x48xf32>
      %150 = arith.addf %138, %149 : vector<8x48xf32>
      %c2_118 = arith.constant 2 : index
      %c0_119 = arith.constant 0 : index
      %c0_120 = arith.constant 0 : index
      %151 = vector.load %arg15[%c2_118, %c0_119, %c0_120] : memref<3x8x1xf32, #tpu.memory_space<vmem>>, vector<1x8x1xf32>
      %152 = vector.shape_cast %151 : vector<1x8x1xf32> to vector<8x1xf32>
      %153 = tpu.reciprocal %152 : vector<8x1xf32> -> vector<8x1xf32>
      %c2_121 = arith.constant 2 : index
      %c0_122 = arith.constant 0 : index
      %c0_123 = arith.constant 0 : index
      %154 = vector.load %arg16[%c2_121, %c0_122, %c0_123] : memref<3x8x16xf32, #tpu.memory_space<vmem>>, vector<1x8x16xf32>
      %155 = vector.shape_cast %154 : vector<1x8x16xf32> to vector<8x16xf32>
      %156 = vector.broadcast %153 : vector<8x1xf32> to vector<8x16xf32>
      %157 = arith.mulf %155, %156 : vector<8x16xf32>
      %158 = arith.truncf %157 : vector<8x16xf32> to vector<8x16xbf16>
      %c2_124 = arith.constant 2 : index
      %c0_125 = arith.constant 0 : index
      %c0_126 = arith.constant 0 : index
      %159 = vector.load %arg9[%c2_124, %c0_125, %c0_126] : memref<3x16x48xbf16, #tpu.memory_space<vmem>>, vector<1x16x48xbf16>
      %160 = vector.shape_cast %159 : vector<1x16x48xbf16> to vector<16x48xbf16>
      %cst_127 = arith.constant dense<0.000000e+00> : vector<8x48xf32>
      %161 = tpu.matmul %158, %160, %cst_127 {dimension_numbers = #tpu.dot_dimension_numbers<[1], [0], [0], [1], [0, 0, 1, 1], [], []>} : vector<8x16xbf16>, vector<16x48xbf16>, vector<8x48xf32> -> vector<8x48xf32>
      %162 = arith.addf %150, %161 : vector<8x48xf32>
      %c0_128 = arith.constant 0 : index
      %c0_129 = arith.constant 0 : index
      %c0_130 = arith.constant 0 : index
      %163 = vector.load %arg10[%c0_128, %c0_129, %c0_130] : memref<1x8x48xf32, #tpu.memory_space<vmem>>, vector<1x8x48xf32>
      %164 = vector.shape_cast %163 : vector<1x8x48xf32> to vector<8x48xf32>
      %165 = vector.shape_cast %162 : vector<8x48xf32> to vector<1x8x48xf32>
      tpu.vector_store %arg10[%c0_128, %c0_129, %c0_130], %165 {strides = array<i32>} : memref<1x8x48xf32, #tpu.memory_space<vmem>>, vector<1x8x48xf32>,
    } else {
    }
    return
  }
  func.func @transform_0(%arg0: i32, %arg1: i32, %arg2: i32) -> (i32, i32, i32) {
    %c0_i32 = arith.constant 0 : i32
    %c0_i32_0 = arith.constant 0 : i32
    return %arg0, %arg1, %c0_i32 : i32, i32, i32
  }
  func.func @transform_1(%arg0: i32, %arg1: i32, %arg2: i32) -> (i32, i32, i32) {
    %c0_i32 = arith.constant 0 : i32
    %c0_i32_0 = arith.constant 0 : i32
    return %arg0, %arg2, %c0_i32 : i32, i32, i32
  }
  func.func @transform_2(%arg0: i32, %arg1: i32, %arg2: i32) -> (i32, i32, i32) {
    %c0_i32 = arith.constant 0 : i32
    %c0_i32_0 = arith.constant 0 : i32
    return %arg0, %arg2, %c0_i32 : i32, i32, i32
  }
  func.func @transform_3(%arg0: i32, %arg1: i32, %arg2: i32) -> (i32, i32) {
    %c0_i32 = arith.constant 0 : i32
    %c0_i32_0 = arith.constant 0 : i32
    %c0_i32_1 = arith.constant 0 : i32
    return %c0_i32, %c0_i32_0 : i32, i32
  }
  func.func @transform_4(%arg0: i32, %arg1: i32, %arg2: i32) -> (i32, i32) {
    %c0_i32 = arith.constant 0 : i32
    %c0_i32_0 = arith.constant 0 : i32
    %c0_i32_1 = arith.constant 0 : i32
    return %c0_i32, %c0_i32_0 : i32, i32
  }
  func.func @transform_5(%arg0: i32, %arg1: i32, %arg2: i32) -> (i32, i32) {
    %c0_i32 = arith.constant 0 : i32
    %c0_i32_0 = arith.constant 0 : i32
    %c0_i32_1 = arith.constant 0 : i32
    return %c0_i32, %c0_i32_0 : i32, i32
  }
  func.func @transform_6(%arg0: i32, %arg1: i32, %arg2: i32) -> (i32, i32, i32) {
    %c0_i32 = arith.constant 0 : i32
    %c0_i32_0 = arith.constant 0 : i32
    %c0_i32_1 = arith.constant 0 : i32
    %c0_i32_2 = arith.constant 0 : i32
    return %c0_i32, %c0_i32_0, %c0_i32_1 : i32, i32, i32
  }
  func.func @transform_7(%arg0: i32, %arg1: i32, %arg2: i32) -> (i32, i32, i32) {
    %c0_i32 = arith.constant 0 : i32
    %c0_i32_0 = arith.constant 0 : i32
    return %arg0, %arg1, %c0_i32 : i32, i32, i32
  }
}

</mosaic_0001>

<bundles_post_ra>
// kernel: tpu_custom_call.1
= control target key start
LH: loop header
LB: loop body
LE: loop exit
PB: predicated region body
PF: predicated region fallthrough
CT: control target
= control target key end

     0   :  { %s2671_s0 = inlined_call_operand.hbm [shape: bf16[2,8,48], index: 0, kind: input, shape index: {}]   ;;  %s2672_s1 = inlined_call_operand.hbm [shape: bf16[2,8,48], index: 1, kind: input, shape index: {}]   ;;  %s2673_s2 = inlined_call_operand.hbm [shape: bf16[2,8,48], index: 2, kind: input, shape index: {}]   ;;  %s2674_s3 = inlined_call_operand.hbm [shape: bf16[48,48], index: 3, kind: input, shape index: {}]   ;;  %s2675_s4 = inlined_call_operand.hbm [shape: bf16[48,48], index: 4, kind: input, shape index: {}]   ;;  %s2676_s5 = inlined_call_operand.hbm [shape: bf16[48,48], index: 5, kind: input, shape index: {}]   ;;  %s2677_s6 = inlined_call_operand.hbm [shape: bf16[3,16,48], index: 6, kind: input, shape index: {}]   ;;  %s2678_s7 = inlined_call_operand.hbm [shape: f32[2,8,48], index: 7, kind: output, shape index: {}]  }
   0x1   :  { %2703 = sst [smem:[#allocation32_spill]] %s2672_s1 }
   0x2   :  { %2704 = sst [smem:[#allocation33_spill]] %s2674_s3 }
   0x3   :  { %2705 = sst [smem:[#allocation34_spill]] %s2676_s5 }
   0x4   :  { %2706 = sst [smem:[#allocation35_spill]] %s2678_s7 }
   0x5   :  { %12 = vsyncpa [#allocation9], 0 }
   0x6   :  { %14 = vsyncpa [#allocation9 + $0x1], 0 }
   0x7   :  { %15 = vsyncpa [#allocation12], 0 }
   0x8   :  { %17 = vsyncpa [#allocation12 + $0x1], 0 }
   0x9   :  { %18 = vsyncpa [#allocation15], 0 }
   0xa   :  { %19 = vsyncpa [#allocation18], 0 }
   0xb   :  { %20 = vsyncpa [#allocation10], 0 }
   0xc   :  { %22 = vsyncpa [#allocation10 + $0x1], 0  ;;  %s2173_s24 = smov 0   ;;  %s2175_s25 = smov 0  }
   0xd   :  { %s2177_s26 = smov 0   ;;  %s2179_s27 = smov 0  }
   0xe   :  { %s2181_s28 = smov 0   ;;  %s2183_s29 = smov 0  }
   0xf LB: > { %2707 = sst [smem:[#allocation26_spill]] %s2095_s24  ;;  %s2204_s30 = sadd.s32 4294967295, %s2115_s29   ;;  %s2115_s29 = sphi %s2183_s29, %s28_s29   ;;  %s2111_s28 = sphi %s2181_s28, %s2748_s28   ;;  %s2107_s27 = sphi %s2179_s27, %s2747_s27   ;;  %s2103_s26 = sphi %s2177_s26, %s2751_s26   ;;  %s2099_s25 = sphi %s2175_s25, %s2750_s25   ;;  %s2095_s24 = sphi %s2173_s24, %s2749_s24  }
  0x10   : > { %2708 = sst [smem:[#allocation27_spill]] %s2111_s28  ;;  %p1483_p0 = scmp.ge.s32.totalorder %s2115_s29, 1 }
  0x11   : > { %2709 = sst [smem:[#allocation28_spill]] %s2115_s29  ;;  %p2688_p1 = scmp.eq.s32.totalorder %s2204_s30, 0 }
  0x12   : > { %p248_p2 = scmp.lt.s32.totalorder %s2115_s29, 3  ;;  %s2117_s9 = smov [#allocation14]  }
  0x13   : > { %s260_s10 = sshll.u32 %s2117_s9, 4  ;;  %s2118_s12 = smov [#allocation17]   ;;  %s2213_s10 = int_to_ptr.vmem [resolvable:$true] %s260_s10 }
  0x14   : > { %p2209_p3 = pnand %p1483_p0, %p248_p2  ;;  %s286_s13 = sshll.u32 %s2118_s12, 4  ;;  %s2224_s13 = int_to_ptr.vmem [resolvable:$true] %s286_s13 }
  0x15   : > { %s2712_s3 = sld [smem:[#allocation33_spill]] }
  0x16   : > { %s2710_s8 = scalar_select %p2209_p3, 1, 0 }
  0x17   : > { %p1684_p4 = pneg %p2209_p3 }
  0x19   : > { %p2220_p6 = pnand %p1684_p4, %p2688_p1 }
  0x1b   : > { %s2711_s11 = scalar_select %p2220_p6, 1, 0 }
  0x1c   : > { %s1819_s16 = scalar_lea.hbm %s2712_s3, 384  ;;  %p2234_p8 = pneg %p2220_p6 }
  0x1d   : > { %p1820_p7 = scmp.ne.s32.totalorder %s2712_s3, %s1819_s16  ;;  %p1826_p11 = scmp.lt.u32.totalorder %s1819_s16, %s2712_s3 }
  0x1e   : > { %s2713_s19 = scalar_select %p2234_p8, 1, 0 }
  0x1f   : > { %p1822_p9 = pnand %p2234_p8, %p1820_p7 }
  0x21   : > { %p1823_p10 = pneg %p1822_p9 }
  0x23   : > { %p1828_p12 = pnand %p1826_p11, %p1823_p10 }
  0x25   : > { %1831 = shalt.err (!%p1828_p12)
}
  0x26   : > { %s1832_s22 = scalar_lea.vmem %s2213_s10, 384  ;;  %p1840_p4 = scmp.lt.s32.totalorder %s2213_s10, %s2213_s10 }
  0x27   : > { %p1833_p13 = scmp.ne.s32.totalorder %s2213_s10, %s1832_s22  ;;  %p1841_p5 = scmp.lt.s32.totalorder %s1832_s22, %s1832_s22 }
  0x29   : > { %p1835_p0 = pnand %p1833_p13, %p2234_p8  ;;  %p1842_p7 = por %p1841_p5, %p1840_p4 }
  0x2b   : > { %p1836_p2 = pneg %p1835_p0 }
  0x2d   : > { %p1843_p9 = pnand %p1842_p7, %p1836_p2 }
  0x2f   : > { %1846 = shalt.err (!%p1843_p9)
}
  0x30   : > { %s2679_s23 = smov 64   ;;  %s2681_s9 = smov 4  }
  0x31   : > { %1687 = dma.hbm_to_vmem [thread:$0]  (!%p2220_p6), %s2712_s3, 384, %s2213_s10, [#allocation15], %s2679_s23, %s2679_s23, %s2681_s9  }
  0x32   : > { %s2714_s5 = sld [smem:[#allocation34_spill]] }
  0x38   : > { %s1847_s17 = scalar_lea.hbm %s2714_s5, 384 }
  0x39   : > { %p1848_p5 = scmp.ne.s32.totalorder %s2714_s5, %s1847_s17  ;;  %p1854_p12 = scmp.lt.u32.totalorder %s1847_s17, %s2714_s5 }
  0x3b   : > { %p1850_p10 = pnand %p1848_p5, %p2234_p8 }
  0x3d   : > { %p1851_p11 = pneg %p1850_p10 }
  0x3f   : > { %p1856_p13 = pnand %p1854_p12, %p1851_p11 }
  0x41   : > { %1859 = shalt.err (!%p1856_p13)
}
  0x42   : > { %s1860_s10 = scalar_lea.vmem %s2224_s13, 384  ;;  %p1868_p7 = scmp.lt.s32.totalorder %s2224_s13, %s2224_s13 }
  0x43   : > { %p1861_p0 = scmp.ne.s32.totalorder %s2224_s13, %s1860_s10  ;;  %p1869_p9 = scmp.lt.s32.totalorder %s1860_s10, %s1860_s10 }
  0x45   : > { %p1863_p2 = pnand %p1861_p0, %p2234_p8  ;;  %p1870_p5 = por %p1869_p9, %p1868_p7 }
  0x47   : > { %p1864_p4 = pneg %p1863_p2 }
  0x49   : > { %p1871_p10 = pnand %p1870_p5, %p1864_p4 }
  0x4b   : > { %1874 = shalt.err (!%p1871_p10)
}
  0x4c   : > { %1693 = dma.hbm_to_vmem [thread:$0]  (!%p2220_p6), %s2714_s5, 384, %s2224_s13, [#allocation18], %s2679_s23, %s2679_s23, %s2681_s9  }
  0x4d   : > { %s1482_s15 = sadd.s32 4294967294, %s2115_s29   ;;  %s47_s16 = sadd.s32 1, %s2111_s28 }
  0x4e   : > { %p49_p11 = scmp.ge.s32.totalorder %s47_s16, 2  ;;  %s56_s17 = sadd.s32 1, %s2103_s26 }
  0x4f   : > { %p63_p12 = scmp.ne.s32.totalorder %s2103_s26, %s2099_s25  ;;  %p64_p13 = scmp.eq.s32.totalorder %s2115_s29, 0 }
  0x50   : > { %s2753_s16 = smov (%p49_p11, %s47_s16), 0  ;;  %p69_p2 = scmp.ne.s32.totalorder %s2099_s25, %s2095_s24 }
  0x51   : > { %2715 = sst [smem:[#allocation29_spill]] %s2753_s16  ;;  %p2292_p0 = por %p64_p13, %p63_p12 }
  0x52   : > { %s51_s13 = ssub.s32 %s2111_s28, %s2753_s16  ;;  %p235_p4 = scmp.eq.s32.totalorder %s2204_s30, 1 }
  0x53   : > { %p54_p7 = scmp.eq.s32.totalorder %s51_s13, 0  ;;  %p2303_p9 = por %p2688_p1, %p69_p2 }
  0x54   : > { %p2307_p5 = por %p235_p4, %p63_p12  ;;  %p241_p10 = scmp.eq.s32.totalorder %s1482_s15, 1 }
  0x55   : > { %s2717_s20 = scalar_select %p2303_p9, 1, 0 }
  0x56   : > { %s2718_s21 = scalar_select %p2307_p5, 1, 0 }
  0x57   : > { %s2312_s22 = scalar_select %p54_p7, %s2103_s26, %s56_s17  }
  0x58   : > { %p2314_p11 = por %p241_p10, %p69_p2  ;;  %p1715_p13 = scmp.lt.s32.totalorder %s2115_s29, 2 }
  0x59   : > { %2719 = sst [smem:[#allocation30_spill]] %s2312_s22  ;;  %s2683_s12 = sand.u32 1, %s2103_s26  }
  0x5a   : > { %s2720_s10 = scalar_select %p2314_p11, 1, 0 }
  0x5b   : > { %s2321_s14 = sshll.u32 %s2111_s28, 6  ;;  %s2325_s13 = sshll.u32 %s2683_s12, 2 }
  0x5c   : > { %2721 = sst [smem:[#allocation31_spill]] %s2720_s10  ;;  %p2329_p12 = pnand %p1715_p13, %p2292_p0 }
  0x5d   : > { %s332_s15 = sand.u32 1, %s2115_s29   ;;  %s2723_s1 = sld [smem:[#allocation32_spill]] }
  0x5e   : > { %s2722_s23 = scalar_select %p2329_p12, 1, 0 }
  0x5f   : > { %s336_s5 = scalar_lea.vmem [#allocation11], %s2325_s13  ;;  %s2343_s18 = scalar_lea.sflag [#allocation12], %s332_s15 }
  0x60   : > { %s344_s12 = sshll.u32 %s336_s5, 4  ;;  %p2349_p2 = pneg %p2329_p12  ;;  %s2341_s12 = int_to_ptr.vmem [resolvable:$true] %s344_s12 }
  0x62   : > { %s2724_s28 = scalar_select %p2349_p2, 1, 0 }
  0x63   : > { %s2338_s3 = scalar_lea.hbm %s2723_s1, %s2321_s14  ;;  %s1880_s22 = scalar_lea.hbm %s2723_s1, 128 }
  0x64   : > { %s1875_s16 = scalar_lea.hbm %s2338_s3, 64  ;;  %p1881_p10 = scmp.lt.u32.totalorder %s2338_s3, %s2723_s1 }
  0x65   : > { %p1876_p0 = scmp.ne.s32.totalorder %s2338_s3, %s1875_s16  ;;  %p1882_p13 = scmp.lt.u32.totalorder %s1880_s22, %s1875_s16 }
  0x66   : > { %p1884_p11 = scmp.lt.u32.totalorder %s1875_s16, %s2338_s3 }
  0x67   : > { %p1878_p4 = pnand %p2349_p2, %p1876_p0  ;;  %p1883_p1 = por %p1882_p13, %p1881_p10 }
  0x69   : > { %p1879_p7 = pneg %p1878_p4  ;;  %p1885_p5 = por %p1884_p11, %p1883_p1 }
  0x6b   : > { %p1886_p9 = pnand %p1885_p5, %p1879_p7 }
  0x6d   : > { %1889 = shalt.err (!%p1886_p9)
}
  0x6e   : > { %s1890_s15 = scalar_lea.vmem %s2341_s12, 64  ;;  %s2121_s9 = smov [#allocation11]  }
  0x6f   : > { %p1891_p0 = scmp.ne.s32.totalorder %s2341_s12, %s1890_s15  ;;  %s1895_s17 = sshll.u32 %s2121_s9, 4  ;;  %s1896_s17 = int_to_ptr.vmem [resolvable:$false] %s1895_s17 }
  0x70   : > { %s1897_s29 = scalar_lea.vmem %s1896_s17, 128  ;;  %p1898_p6 = scmp.lt.s32.totalorder %s2341_s12, %s1896_s17 }
  0x71   : > { %p1893_p4 = pnand %p1891_p0, %p2349_p2  ;;  %p1899_p8 = scmp.lt.s32.totalorder %s1897_s29, %s1890_s15 }
  0x73   : > { %p1894_p3 = pneg %p1893_p4  ;;  %p1900_p10 = por %p1899_p8, %p1898_p6 }
  0x75   : > { %p1901_p13 = pnand %p1900_p10, %p1894_p3 }
  0x77   : > { %1904 = shalt.err (!%p1901_p13)
}
  0x78   : > { %1703 = dma.hbm_to_vmem [thread:$0]  (!%p2329_p12), %s2338_s3, 64, %s2341_s12, %s2343_s18  }
  0x79   : > { %s2122_s16 = smov [#allocation16]   ;;  %s2123_s5 = smov [#allocation19]  }
  0x7a   : > { %s273_s22 = sshll.u32 %s2122_s16, 4  ;;  %s299_s1 = sshll.u32 %s2123_s5, 4  ;;  %s274_s22 = int_to_ptr.vmem [resolvable:$true] %s273_s22  ;;  %s300_s1 = int_to_ptr.vmem [resolvable:$true] %s299_s1 }
  0x7b   : > { %s1905_s17 = scalar_lea.hbm %s2675_s4, 384  ;;  %p2725_p3 = scmp.ne.s32.totalorder %s2713_s19, 0 }
  0x7c   : > { %p1906_p1 = scmp.ne.s32.totalorder %s2675_s4, %s1905_s17  ;;  %p1912_p9 = scmp.lt.u32.totalorder %s1905_s17, %s2675_s4 }
  0x7e   : > { %p1908_p6 = pnand %p1906_p1, %p2725_p3 }
  0x80   : > { %p1909_p8 = pneg %p1908_p6 }
  0x82   : > { %p1914_p5 = pnand %p1912_p9, %p1909_p8 }
  0x84   : > { %1917 = shalt.err (!%p1914_p5)
}
  0x85   : > { %s1918_s3 = scalar_lea.vmem %s274_s22, 384  ;;  %p1926_p4 = scmp.lt.s32.totalorder %s274_s22, %s274_s22 }
  0x86   : > { %p1919_p11 = scmp.ne.s32.totalorder %s274_s22, %s1918_s3  ;;  %p1927_p10 = scmp.lt.s32.totalorder %s1918_s3, %s1918_s3 }
  0x88   : > { %p1921_p7 = pnand %p1919_p11, %p2725_p3  ;;  %p1928_p13 = por %p1927_p10, %p1926_p4 }
  0x8a   : > { %p1922_p0 = pneg %p1921_p7 }
  0x8c   : > { %p1929_p12 = pnand %p1928_p13, %p1922_p0 }
  0x8e   : > { %1932 = shalt.err (!%p1929_p12)
}
  0x8f   : > { %p2726_p1 = scmp.ne.s32.totalorder %s2711_s11, 0  ;;  %s2727_s10 = smov 4  }
  0x90   : > { %s2728_s12 = smov 64   ;;  %s1933_s9 = scalar_lea.hbm %s2677_s6, 384 }
  0x91   : > { %1690 = dma.hbm_to_vmem [thread:$0]  (!%p2726_p1), %s2675_s4, 384, %s274_s22, [#allocation15], %s2728_s12, %s2728_s12, %s2727_s10  }
  0x92   : > { %p1934_p6 = scmp.ne.s32.totalorder %s2677_s6, %s1933_s9  ;;  %p1940_p9 = scmp.lt.u32.totalorder %s1933_s9, %s2677_s6 }
  0x94   : > { %p1936_p12 = pnand %p1934_p6, %p2725_p3 }
  0x96   : > { %p1937_p8 = pneg %p1936_p12 }
  0x98   : > { %p1942_p5 = pnand %p1940_p9, %p1937_p8 }
  0x9a   : > { %1945 = shalt.err (!%p1942_p5)
}
  0x9b   : > { %s1946_s7 = scalar_lea.vmem %s300_s1, 384  ;;  %p1954_p4 = scmp.lt.s32.totalorder %s300_s1, %s300_s1 }
  0x9c   : > { %p1947_p11 = scmp.ne.s32.totalorder %s300_s1, %s1946_s7  ;;  %p1955_p10 = scmp.lt.s32.totalorder %s1946_s7, %s1946_s7 }
  0x9e   : > { %p1949_p7 = pnand %p1947_p11, %p2725_p3  ;;  %p1956_p13 = por %p1955_p10, %p1954_p4 }
  0xa0   : > { %p1950_p0 = pneg %p1949_p7 }
  0xa2   : > { %p1957_p2 = pnand %p1956_p13, %p1950_p0 }
  0xa4   : > { %1960 = shalt.err (!%p1957_p2)
}
  0xa5   : > { %1696 = dma.hbm_to_vmem [thread:$0]  (!%p2726_p1), %s2677_s6, 384, %s300_s1, [#allocation18], %s2728_s12, %s2728_s12, %s2727_s10  }
  0xa6   : > { %s2419_s5 = scalar_lea.hbm %s2671_s0, %s2321_s14  ;;  %s317_s11 = scalar_lea.vmem [#allocation8], %s2325_s13 }
  0xa7   : > { %s325_s9 = sshll.u32 %s317_s11, 4  ;;  %s2428_s29 = scalar_lea.hbm %s2673_s2, %s2321_s14  ;;  %s2422_s9 = int_to_ptr.vmem [resolvable:$true] %s325_s9 }
  0xa8   : > { %s2729_s3 = sand.u32 1, %s2103_s26   ;;  %s1961_s10 = scalar_lea.hbm %s2419_s5, 64 }
  0xa9   : > { %s314_s1 = scalar_lea.sflag [#allocation9], %s2729_s3  ;;  %p1962_p2 = scmp.ne.s32.totalorder %s2419_s5, %s1961_s10 }
  0xaa   : > { %p2730_p3 = scmp.ne.s32.totalorder %s2724_s28, 0  ;;  %s1966_s22 = scalar_lea.hbm %s2671_s0, 128 }
  0xab   : > { %p1967_p12 = scmp.lt.u32.totalorder %s2419_s5, %s2671_s0  ;;  %p1968_p8 = scmp.lt.u32.totalorder %s1966_s22, %s1961_s10 }
  0xac   : > { %p1964_p1 = pnand %p1962_p2, %p2730_p3  ;;  %p1970_p5 = scmp.lt.u32.totalorder %s1961_s10, %s2419_s5 }
  0xad   : > { %p1969_p9 = por %p1968_p8, %p1967_p12 }
  0xae   : > { %p1965_p6 = pneg %p1964_p1 }
  0xaf   : > { %p1971_p11 = por %p1970_p5, %p1969_p9 }
  0xb1   : > { %p1972_p7 = pnand %p1971_p11, %p1965_p6 }
  0xb3   : > { %1975 = shalt.err (!%p1972_p7)
}
  0xb4   : > { %s1976_s14 = scalar_lea.vmem %s2422_s9, 64  ;;  %s2124_s16 = smov [#allocation8]  }
  0xb5   : > { %p1977_p0 = scmp.ne.s32.totalorder %s2422_s9, %s1976_s14  ;;  %s1981_s11 = sshll.u32 %s2124_s16, 4  ;;  %s1982_s11 = int_to_ptr.vmem [resolvable:$false] %s1981_s11 }
  0xb6   : > { %s1983_s17 = scalar_lea.vmem %s1982_s11, 128  ;;  %p1984_p13 = scmp.lt.s32.totalorder %s2422_s9, %s1982_s11 }
  0xb7   : > { %p1979_p4 = pnand %p1977_p0, %p2730_p3  ;;  %p1985_p2 = scmp.lt.s32.totalorder %s1983_s17, %s1976_s14 }
  0xb9   : > { %p1980_p10 = pneg %p1979_p4  ;;  %p1986_p1 = por %p1985_p2, %p1984_p13 }
  0xbb   : > { %p1987_p12 = pnand %p1986_p1, %p1980_p10 }
  0xbd   : > { %1990 = shalt.err (!%p1987_p12)
}
  0xbe   : > { %p2731_p6 = scmp.ne.s32.totalorder %s2722_s23, 0  ;;  %s355_s15 = scalar_lea.vmem [#allocation13], %s2325_s13 }
  0xbf   : > { %s363_s3 = sshll.u32 %s355_s15, 4  ;;  %s1991_s10 = scalar_lea.hbm %s2428_s29, 64  ;;  %s364_s3 = int_to_ptr.vmem [resolvable:$true] %s363_s3 }
  0xc0   : > { %1700 = dma.hbm_to_vmem [thread:$0]  (!%p2731_p6), %s2419_s5, 64, %s2422_s9, %s314_s1  }
  0xc1   : > { %p1992_p8 = scmp.ne.s32.totalorder %s2428_s29, %s1991_s10  ;;  %s1996_s22 = scalar_lea.hbm %s2673_s2, 128 }
  0xc2   : > { %p1997_p11 = scmp.lt.u32.totalorder %s2428_s29, %s2673_s2  ;;  %p1998_p7 = scmp.lt.u32.totalorder %s1996_s22, %s1991_s10 }
  0xc3   : > { %p1994_p9 = pnand %p1992_p8, %p2730_p3  ;;  %p2000_p4 = scmp.lt.u32.totalorder %s1991_s10, %s2428_s29 }
  0xc4   : > { %p1999_p0 = por %p1998_p7, %p1997_p11 }
  0xc5   : > { %p1995_p5 = pneg %p1994_p9 }
  0xc6   : > { %p2001_p10 = por %p2000_p4, %p1999_p0 }
  0xc8   : > { %p2002_p13 = pnand %p2001_p10, %p1995_p5 }
  0xca   : > { %2005 = shalt.err (!%p2002_p13)
}
  0xcb   : > { %s2006_s13 = scalar_lea.vmem %s364_s3, 64  ;;  %s2125_s5 = smov [#allocation13]  }
  0xcc   : > { %p2007_p2 = scmp.ne.s32.totalorder %s364_s3, %s2006_s13  ;;  %s2011_s9 = sshll.u32 %s2125_s5, 4  ;;  %s2012_s9 = int_to_ptr.vmem [resolvable:$false] %s2011_s9 }
  0xcd   : > { %s2013_s1 = scalar_lea.vmem %s2012_s9, 128  ;;  %p2014_p8 = scmp.lt.s32.totalorder %s364_s3, %s2012_s9 }
  0xce   : > { %p2009_p1 = pnand %p2007_p2, %p2730_p3  ;;  %p2015_p9 = scmp.lt.s32.totalorder %s2013_s1, %s2006_s13 }
  0xd0   : > { %p2010_p12 = pneg %p2009_p1  ;;  %p2016_p6 = por %p2015_p9, %p2014_p8 }
  0xd2   : > { %p2017_p7 = pnand %p2016_p6, %p2010_p12 }
  0xd4   : > { %2020 = shalt.err (!%p2017_p7)
}
  0xd5   : > { %p2732_p11 = scmp.ne.s32.totalorder %s2722_s23, 0  ;;  %p2733_p5 = scmp.ne.s32.totalorder %s2710_s8, 0 }
  0xd6   : > { %s2475_s28 = sand.u32 (!%p2733_p5), 1, %s2099_s25   ;;  %p2734_p3 = scmp.ne.s32.totalorder (!%p2733_p5), %s2717_s20, 0 }
  0xd7   : > { %1706 = dma.hbm_to_vmem [thread:$0]  (!%p2732_p11), %s2428_s29, 64, %s364_s3, %s2343_s18  }
  0xd8   : > { %372 = sbr.rel (%p2733_p5) target bundleno = 1654 (0x676), region = 48  ;;  %s2478_s14 = sshll.u32 (!%p2733_p5), %s2475_s28, 2 }
  0xd9   : > { %s375_s16 = scalar_lea.sflag (!%p2733_p5), [#allocation9], %s2475_s28  ;;  %s378_s11 = scalar_lea.vmem (!%p2733_p5), [#allocation8], %s2478_s14 }
  0xdf   : > { %2074 = dma.done.wait (%p2734_p3), %s375_s16, 64  }
  0xe0   : > { %2076 = vsyncadd (%p2734_p3), %s375_s16, 4294967232  ;;  %s383_s8 = sand.u32 1, %s2204_s30   ;;  %s387_s18 = scalar_lea.vmem [#allocation11], %s2478_s14 }
  0xe1   : > { %s384_s23 = scalar_lea.sflag [#allocation12], %s383_s8 }
  0xe2   : > { %2078 = dma.done.wait (%p2734_p3), %s384_s23, 128  }
  0xe3   : > { %2080 = vsyncadd (%p2734_p3), %s384_s23, 4294967168  ;;  %s396_s29 = scalar_lea.vmem [#allocation13], %s2478_s14  ;;  %p2735_p6 = scmp.eq.s32.totalorder %s2204_s30, 0 }
  0xe5   : > { %2082 = dma.done.wait (%p2735_p6), [#allocation15], 768   ;;  %p2736_p0 = pmov %p2735_p6 }
  0xe7   : > { %2084 = vsyncadd (%p2736_p0), [#allocation15], 4294966528  ;;  %p2737_p4 = pmov %p2736_p0 }
  0xe8   : > { %p2738_p10 = pmov %p2736_p0 }
  0xe9   : > { %2086 = dma.done.wait (%p2737_p4), [#allocation18], 768  }
  0xea   : > { %2088 = vsyncadd (%p2738_p10), [#allocation18], 4294966528  ;;  %v2126_v0 = vmov 0.0   ;;  %vm2127_vm0 = vmmov 0   ;;  %v1783_v1 = vld [vmem:[#allocation14] sm:$0xff]   ;;  %v1784_v2 = vld [vmem:[#allocation14 + $0x8] sm:$0xff]  }
  0xeb   : > { %1568 = vmatprep.subr.bf16.mxu1 %v2126_v0  ;;  %1574 = vmatprep.mubr.msk.bf16.mxu1 %vm2127_vm0, %v2126_v0  ;;  %v1785_v3 = vld [vmem:[#allocation14 + $0x10] sm:$0xff]   ;;  %v458_v4 = vld [vmem:[%s378_s11] sm:$0xf]  ;;  %vm483_vm1 = vcmask 392192   ;;  %v1786_v5 = vld [vmem:[#allocation16] sm:$0xff]   ;;  %vm537_vm2 = vcmask 130048  }
  0xec   : > { %1588 = vmatprep.subr.bf16.mxu0 %v2126_v0  ;;  %1594 = vmatprep.mubr.msk.bf16.mxu0 %vm2127_vm0, %v2126_v0  ;;  %v1787_v6 = vld [vmem:[#allocation16 + $0x8] sm:$0xff]   ;;  %v1788_v7 = vld [vmem:[#allocation16 + $0x10] sm:$0xff]   ;;  %v541_v8 = vld [vmem:[%s387_s18] sm:$0xf]  ;;  %538 = vst.msk [vmem:[#allocation7] sm:$0xff] %vm537_vm2, %v2126_v0  ;;  %vm528_vm3 = vcmask 388096  }
  0xed   : > { %1569 = vmatpush3.bf16.msra.mxu1 %v1783_v1  ;;  %539 = vst.msk [vmem:[#allocation7 + $0x8] sm:$0xff] %vm537_vm2, %v2126_v0  ;;  %540 = vst.msk [vmem:[#allocation7 + $0x10] sm:$0xff] %vm537_vm2, %v2126_v0  ;;  %v1793_v9 = vld [vmem:[#allocation17] sm:$0xff]   ;;  %v1794_v10 = vld [vmem:[#allocation17 + $0x8] sm:$0xff]   ;;  %s2128_s30 = smov 96   ;;  %s2129_s20 = smov 112  }
  0xee   : > { %1570 = vmatprep.subr.bf16.mxu1 %v2126_v0  ;;  %1589 = vmatpush3.bf16.msra.mxu0 %v1793_v9  ;;  %v1795_v11 = vld [vmem:[#allocation17 + $0x10] sm:$0xff]   ;;  %v613_v12 = vld [vmem:[%s396_s29] sm:$0xf]  ;;  %vm769_vm4 = vcmask 1043456   ;;  %vm734_vm5 = vcmask 64512   ;;  %vm530_vm6 = vcmask 7168  }
  0xef   : > { %1590 = vmatprep.subr.bf16.mxu0 %v2126_v0  ;;  %v2130_v46 = vmov -inf   ;;  %534 = vst.msk [vmem:[#allocation6] sm:$0xff] %vm530_vm6, %v2126_v0  ;;  %535 = vst.msk [vmem:[#allocation6 + $0x8] sm:$0xff] %vm530_vm6, %v2126_v0  ;;  %v2131_v49 = vmov 0   ;;  %s1503_s17 = sshll.u32 %s2475_s28, 3  ;;  %s1535_s15 = sshll.u32 %s2107_s27, 7 }
  0xf0   : > { %531 = vst.msk [vmem:[#allocation5] sm:$0xff] %vm530_vm6, %v2130_v46  ;;  %532 = vst.msk [vmem:[#allocation5 + $0x8] sm:$0xff] %vm530_vm6, %v2130_v46  ;;  %1781 = vset.pattern.permute.xlu0 %v2131_v49  ;;  %1782 = vset.pattern.permute.xlu1 %v2131_v49  ;;  %s452_s3 = scalar_lea.vmem [#allocation20], %s1503_s17  ;;  %s2739_s22 = sld [smem:[#allocation35_spill]] }
  0xf1   : > { %1571 = vmatpush3.bf16.msra.mxu1 %v1784_v2  ;;  %533 = vst.msk [vmem:[#allocation5 + $0x10] sm:$0xff] %vm530_vm6, %v2130_v46  ;;  %536 = vst.msk [vmem:[#allocation6 + $0x10] sm:$0xff] %vm530_vm6, %v2126_v0  ;;  %s1315_s10 = sshll.u32 %s452_s3, 4  ;;  %s1301_s19 = scalar_lea.sflag [#allocation10], %s2475_s28  ;;  %s2623_s10 = int_to_ptr.vmem [resolvable:$true] %s1315_s10 }
  0xf2   : > { %1572 = vmatprep.subr.bf16.mxu1 %v2126_v0  ;;  %1591 = vmatpush3.bf16.msra.mxu0 %v1794_v10  ;;  %s2021_s13 = scalar_lea.vmem %s2623_s10, 128  ;;  %p2740_p2 = scmp.ne.s32.totalorder %s2718_s21, 0 }
  0xf3   : > { %1592 = vmatprep.subr.bf16.mxu0 %v2126_v0  ;;  %p2022_p13 = scmp.ne.s32.totalorder %s2623_s10, %s2021_s13  ;;  %s2132_s27 = smov [#allocation20]  }
  0xf4   : > { %s2025_s5 = sshll.u32 %s2132_s27, 4  ;;  %s2026_s5 = int_to_ptr.vmem [resolvable:$false] %s2025_s5 }
  0xf5   : > { %1573 = vmatpush3.bf16.msra.mxu1 %v1785_v3  ;;  %p2023_p1 = pnand %p2022_p13, %p2740_p2  ;;  %s2027_s9 = scalar_lea.vmem %s2026_s5, 256 }
  0xf6   : > { %1578 = vmatprep.subr.bf16.mxu1 %v2126_v0  ;;  %1593 = vmatpush3.bf16.msra.mxu0 %v1795_v11  ;;  %s2621_s24 = scalar_lea.hbm %s2739_s22, %s1535_s15  ;;  %p2028_p8 = scmp.lt.s32.totalorder %s2623_s10, %s2026_s5 }
  0xf7   : > { %1610 = vmatprep.subr.bf16.mxu0 %v2126_v0  ;;  %v733_v60 = vld [vmem:[#allocation5] sm:$0xff]  ;;  %v876_v1 = vld [vmem:[#allocation5 + $0x8] sm:$0xff]  ;;  %p2024_p12 = pneg %p2023_p1  ;;  %p2029_p9 = scmp.lt.s32.totalorder %s2027_s9, %s2021_s13 }
  0xf8   : > { %1575 = vmatmul.mubr.msk.bf16.vlgmr.msra.gmra.mrb[0].mxu1 %vm483_vm1, %v458_v4 }
  0xf9   : > { %1579 = vmatpush3.bf16.msra.mxu1 %v1786_v5  ;;  %1584 = vmatprep.mubr.msk.bf16.mxu1 %vm2127_vm0, %v2126_v0  ;;  %p2030_p7 = por %p2029_p9, %p2028_p8 }
  0xfa   : > { %1580 = vmatprep.subr.bf16.mxu1 %v2126_v0  ;;  %1595 = vmatmul.mubr.msk.bf16.vlgmr.msra.gmra.mrb[0].mxu0 %vm483_vm1, %v613_v12 }
  0xfb   : > { %1612 = vmatprep.mubr.msk.bf16.mxu0 %vm2127_vm0, %v2126_v0  ;;  %p2031_p11 = pnand %p2030_p7, %p2024_p12 }
  0xfd   : > { %1581 = vmatpush3.bf16.msra.mxu1 %v1787_v6  ;;  %v2573_v6 = vld [vmem:[#allocation5 + $0x10] sm:$0xff] }
  0xfe   : > { %1582 = vmatprep.subr.bf16.mxu1 %v2126_v0 }
 0x101   : > { %1583 = vmatpush3.bf16.msra.mxu1 %v1788_v7 }
 0x102   : > { %1598 = vmatprep.subr.bf16.mxu1 %v2126_v0 }
 0x104   : > { %1585 = vmatmul.mubr.msk.bf16.vlgmr.msra.gmra.mrb[4].mxu1 %vm483_vm1, %v541_v8 }
 0x105   : > { %1600 = vmatprep.mubr.msk.bf16.mxu1 %vm2127_vm0, %v2126_v0 }
 0x1cb   : > { %v521_v13 = vpop.f32.mrb[0].mxu1 }
 0x1cc   : > { %v527_v14 = vpack.c.bf16 %v521_v13, %v521_v13  ;;  %v1576_v15 = vpop.f32.mrb[1].mxu1 }
 0x1cd   : > { %v524_v16 = vpop.f32.mrb[2].mxu1  ;;  %v675_v30 = vpop.f32.mrb[0].mxu0 }
 0x1ce   : > { %529 = vst.msk [vmem:[#allocation2] sm:$0xf] %vm528_vm3, %v527_v14  ;;  %v1577_v17 = vpop.f32.mrb[3].mxu1  ;;  %v681_v31 = vpack.c.bf16 %v675_v30, %v675_v30  ;;  %v1596_v32 = vpop.f32.mrb[1].mxu0 }
 0x1cf   : > { %v678_v33 = vpop.f32.mrb[2].mxu0 }
 0x1d0   : > { %682 = vst.msk [vmem:[#allocation4] sm:$0xf] %vm528_vm3, %v681_v31  ;;  %v1597_v34 = vpop.f32.mrb[3].mxu0 }
 0x1d5   : > { %v1791_v27 = vld [vmem:[#allocation2] ss:$0 sps:$4 sm:$0xff]  }
 0x1d6   : > { %v1792_v28 = vld [vmem:[#allocation2] ss:$0 sps:$4 sm:$0xff]  }
 0x1d7   : > { %v604_v18 = vpop.f32.mrb[4].mxu1  ;;  %v683_v29 = vld [vmem:[#allocation2] sm:$0xf]  ;;  %v685_v41 = vld [vmem:[#allocation4] sm:$0xf] }
 0x1d8   : > { %v610_v19 = vpack.c.bf16 %v604_v18, %v604_v18  ;;  %v1586_v20 = vpop.f32.mrb[5].mxu1  ;;  %v771_v42 = vsel %vm769_vm4, %v685_v41, 0  ;;  %v1796_v5 = vld [vmem:[#allocation4] ss:$0 sps:$4 sm:$0xff]   ;;  %v758_v41 = vld [vmem:[#allocation7] sm:$0xff] }
 0x1d9   : > { %v607_v21 = vpop.f32.mrb[6].mxu1  ;;  %v1797_v10 = vld [vmem:[#allocation4] ss:$0 sps:$4 sm:$0xff]  }
 0x1da   : > { %612 = vst.msk [vmem:[#allocation3] sm:$0xf] %vm528_vm3, %v610_v19  ;;  %v1587_v22 = vpop.f32.mrb[7].mxu1 }
 0x1e1   : > { %v684_v23 = vld [vmem:[#allocation3] sm:$0xf] }
 0x1e2   : > { %v1789_v24 = vld [vmem:[#allocation3] ss:$0 sps:$4 sm:$0xff]   ;;  %v691_v25 = vsel %vm537_vm2, %v684_v23, 0 }
 0x1e3   : > { %v1790_v26 = vld [vmem:[#allocation3] ss:$0 sps:$4 sm:$0xff]   ;;  %1599 = vmatpush3.bf16.xpose.msra.mxu1 %v691_v25  ;;  %974 = vrot.lane.b32.xlu1 %v1789_v24, %s2128_s30 }
 0x1e4   : > { %827 = vrot.lane.b32.xlu0 %v1790_v26, %s2129_s20  ;;  %1604 = vmatprep.subr.bf16.mxu1 %v2126_v0 }
 0x1e7   : > { %969 = vrot.lane.b32.xlu1 %v1791_v27, %s2128_s30 }
 0x1e8   : > { %822 = vrot.lane.b32.xlu0 %v1792_v28, %s2129_s20 }
 0x1ea   : > { %1601 = vmatmul.mubr.msk.bf16.vlgmr.msra.gmra.mrb[8].mxu1 %vm537_vm2, %v683_v29 }
 0x1eb   : > { %1606 = vmatprep.mubr.msk.bf16.mxu1 %vm2127_vm0, %v2126_v0  ;;  %1605 = vmatpush3.bf16.msra.mxu1 %v771_v42 }
 0x1ec   : > { %1616 = vmatprep.subr.bf16.mxu1 %v2126_v0 }
 0x255   : > { %v975_v37 = vpop.permute.xlu1 %974 }
 0x256   : > { %v828_v35 = vpop.permute.xlu0 %827  ;;  %v980_v39 = vsel %vm537_vm2, %v975_v37, 0 }
 0x257   : > { %v833_v36 = vsel %vm537_vm2, %v828_v35, 0 }
 0x258   : > { %1611 = vmatpush3.bf16.xpose.msra.mxu0 %v833_v36  ;;  %v750_v36 = vld [vmem:[#allocation6] sm:$0xff] }
 0x259   : > { %1622 = vmatprep.subr.bf16.mxu0 %v2126_v0  ;;  %v970_v40 = vpop.permute.xlu1 %969 }
 0x25a   : > { %v823_v38 = vpop.permute.xlu0 %822 }
 0x25f   : > { %1613 = vmatmul.mubr.msk.bf16.vlgmr.msra.gmra.mrb[4].mxu0 %vm537_vm2, %v823_v38 }
 0x260   : > { %1623 = vmatpush3.bf16.xpose.msra.mxu0 %v980_v39  ;;  %1624 = vmatprep.mubr.msk.bf16.mxu0 %vm2127_vm0, %v2126_v0 }
 0x261   : > { %1634 = vmatprep.subr.bf16.mxu0 %v2126_v0 }
 0x267   : > { %1625 = vmatmul.mubr.msk.bf16.vlgmr.msra.gmra.mrb[8].mxu0 %vm537_vm2, %v970_v40 }
 0x268   : > { %1636 = vmatprep.mubr.msk.bf16.mxu0 %vm2127_vm0, %v2126_v0 }
 0x2bd   : > { %v727_v43 = vpop.f32.mrb[8].mxu1 }
 0x2be   : > { %v1602_v44 = vpop.f32.mrb[9].mxu1  ;;  %v735_v45 = vsel %vm734_vm5, %v727_v43, -inf }
 0x2bf   : > { %736 = vmax.xlane.f32.xlu0 %v735_v45  ;;  %v730_v47 = vpop.f32.mrb[10].mxu1 }
 0x2c0   : > { %v1603_v48 = vpop.f32.mrb[11].mxu1 }
 0x332   : > { %v869_v50 = vpop.f32.mrb[4].mxu0 }
 0x333   : > { %v1614_v51 = vpop.f32.mrb[5].mxu0  ;;  %v877_v52 = vsel %vm734_vm5, %v869_v50, -inf }
 0x334   : > { %878 = vmax.xlane.f32.xlu1 %v877_v52  ;;  %v872_v53 = vpop.f32.mrb[6].mxu0  ;;  %v893_v51 = vld [vmem:[#allocation6 + $0x8] sm:$0xff] }
 0x335   : > { %v1615_v54 = vpop.f32.mrb[7].mxu0 }
 0x33a   : > { %v1016_v55 = vpop.f32.mrb[8].mxu0 }
 0x33b   : > { %v1626_v56 = vpop.f32.mrb[9].mxu0  ;;  %v1024_v57 = vsel %vm734_vm5, %v1016_v55, -inf }
 0x33c   : > { %v1019_v58 = vpop.f32.mrb[10].mxu0  ;;  %1025 = vmax.xlane.f32.xlu0 %v1024_v57  ;;  %v1040_v56 = vld [vmem:[#allocation6 + $0x10] sm:$0xff] }
 0x33d   : > { %v1627_v59 = vpop.f32.mrb[11].mxu0 }
 0x34c   : > { %v737_v61 = vpop.xlane.xlu0 %736 }
 0x34d   : > { %v738_v62 = vmax.f32 %v733_v60, %v737_v61 }
 0x34f   : > { %v739_v63 = vsub.f32 %v733_v60, %v738_v62  ;;  %815 = vst.msk [vmem:[#allocation5] sm:$0xff] %vm530_vm6, %v738_v62 }
 0x351   : > { %v740_v17 = vmul.f32 1.442695, %v739_v63 }
 0x352   : > { %744 = vperm.xlu0 %1781, %v738_v62  }
 0x3c1   : > { %v879_v2 = vpop.xlane.xlu1 %878 }
 0x3c2   : > { %v880_v3 = vmax.f32 %v876_v1, %v879_v2 }
 0x3c4   : > { %v881_v4 = vsub.f32 %v876_v1, %v880_v3  ;;  %962 = vst.msk [vmem:[#allocation5 + $0x8] sm:$0xff] %vm530_vm6, %v880_v3  ;;  %886 = vperm.xlu1 %1782, %v880_v3   ;;  %v901_v3 = vld [vmem:[#allocation7 + $0x8] sm:$0xff] }
 0x3c6   : > { %v882_v35 = vmul.f32 1.442695, %v881_v4 }
 0x3c8   : > { %912 = vrot.lane.b32.xlu1 %v1796_v5, %s2129_s20 }
 0x3c9   : > { %v1026_v7 = vpop.xlane.xlu0 %1025 }
 0x3ca   : > { %v2577_v8 = vmax.f32 %v2573_v6, %v1026_v7 }
 0x3cc   : > { %v1028_v9 = vsub.f32 %v2573_v6, %v2577_v8  ;;  %1109 = vst.msk [vmem:[#allocation5 + $0x10] sm:$0xff] %vm530_vm6, %v2577_v8  ;;  %1033 = vperm.xlu1 %1782, %v2577_v8  }
 0x3d0   : > { %1059 = vrot.lane.b32.xlu1 %v1797_v10, %s2128_s30 }
 0x3d1   : > { %v745_v11 = vpop.permute.xlu0 %744 }
 0x3d2   : > { %v747_v12 = vsub.f32 %v727_v43, %v745_v11  ;;  %v1798_v43 = vld [vmem:[#allocation19 + $0x8] sm:$0xff]  }
 0x3d3   : > { %1635 = vmatpush3.bf16.msra.mxu0 %v1798_v43 }
 0x3d4   : > { %v748_v13 = vmul.f32 1.442695, %v747_v12  ;;  %1640 = vmatprep.subr.bf16.mxu0 %v2126_v0 }
 0x3d6   : > { %1801 = vpow2.f32 %v748_v13 }
 0x3d7   : > { %1803 = vpow2.f32 %v740_v17 }
 0x3e0   : > { %v1802_v14 = vpop.eup %1801 }
 0x3e1   : > { %v752_v15 = vsel %vm734_vm5, %v1802_v14, 0.0  ;;  %v765_v16 = vpack.c.bf16 %v1802_v14, %v1802_v14  ;;  %v1804_v18 = vpop.eup %1803 }
 0x3e2   : > { %753 = vadd.xlane.f32.xlu0 %v752_v15  ;;  %v751_v38 = vmul.f32 %v1804_v18, %v750_v36 }
 0x3e3   : > { %1607 = vmatmul.mubr.msk.bf16.vlgmr.msra.gmra.mrb[12].mxu1 %vm734_vm5, %v765_v16 }
 0x3e4   : > { %1618 = vmatprep.mubr.msk.bf16.mxu1 %vm2127_vm0, %v2126_v0 }
 0x3f8   : > { %761 = vperm.xlu0 %1781, %v1804_v18   ;;  %v1048_v18 = vld [vmem:[#allocation7 + $0x10] sm:$0xff] }
 0x443   : > { %v887_v19 = vpop.permute.xlu1 %886 }
 0x444   : > { %v889_v20 = vsub.f32 %v869_v50, %v887_v19  ;;  %v1029_v50 = vmul.f32 1.442695, %v1028_v9  ;;  %v1799_v19 = vld [vmem:[#allocation19] sm:$0xff]  }
 0x446   : > { %v890_v21 = vmul.f32 1.442695, %v889_v20 }
 0x447   : > { %v913_v22 = vpop.permute.xlu1 %912 }
 0x448   : > { %1805 = vpow2.f32 %v890_v21  ;;  %v918_v23 = vsel %vm769_vm4, %v913_v22, 0 }
 0x449   : > { %1617 = vmatpush3.bf16.msra.mxu1 %v918_v23 }
 0x44a   : > { %1628 = vmatprep.subr.bf16.mxu1 %v2126_v0 }
 0x44b   : > { %v1034_v24 = vpop.permute.xlu1 %1033 }
 0x44c   : > { %v1036_v25 = vsub.f32 %v1016_v55, %v1034_v24 }
 0x44e   : > { %v1037_v26 = vmul.f32 1.442695, %v1036_v25 }
 0x44f   : > { %v1060_v28 = vpop.permute.xlu1 %1059 }
 0x450   : > { %1807 = vpow2.f32 %v1037_v26  ;;  %v1065_v31 = vsel %vm769_vm4, %v1060_v28, 0 }
 0x451   : > { %1809 = vpow2.f32 %v882_v35 }
 0x452   : > { %v1806_v27 = vpop.eup %1805  ;;  %1811 = vpow2.f32 %v1029_v50 }
 0x453   : > { %v895_v29 = vsel %vm734_vm5, %v1806_v27, 0.0  ;;  %v908_v30 = vpack.c.bf16 %v1806_v27, %v1806_v27  ;;  %v1800_v27 = vld [vmem:[#allocation19 + $0x10] sm:$0xff]  }
 0x454   : > { %896 = vadd.xlane.f32.xlu1 %v895_v29 }
 0x455   : > { %1619 = vmatmul.mubr.msk.bf16.vlgmr.msra.gmra.mrb[16].mxu1 %vm734_vm5, %v908_v30 }
 0x456   : > { %1629 = vmatpush3.bf16.msra.mxu1 %v1065_v31  ;;  %1630 = vmatprep.mubr.msk.bf16.mxu1 %vm2127_vm0, %v2126_v0 }
 0x45a   : > { %v1808_v32 = vpop.eup %1807 }
 0x45b   : > { %v1042_v33 = vsel %vm734_vm5, %v1808_v32, 0.0  ;;  %v1055_v34 = vpack.c.bf16 %v1808_v32, %v1808_v32  ;;  %v1810_v37 = vpop.eup %1809 }
 0x45c   : > { %1043 = vadd.xlane.f32.xlu1 %v1042_v33  ;;  %v894_v52 = vmul.f32 %v1810_v37, %v893_v51  ;;  %v1812_v55 = vpop.eup %1811 }
 0x45d   : > { %1631 = vmatmul.mubr.msk.bf16.vlgmr.msra.gmra.mrb[20].mxu1 %vm734_vm5, %v1055_v34  ;;  %v1041_v57 = vmul.f32 %v1812_v55, %v1040_v56 }
 0x46d   : > { %904 = vperm.xlu1 %1782, %v1810_v37  }
 0x46f   : > { %v754_v39 = vpop.xlane.xlu0 %753 }
 0x470   : > { %v755_v40 = vadd.f32 %v754_v39, %v751_v38 }
 0x472   : > { %757 = vst.msk [vmem:[#allocation6] sm:$0xff] %vm530_vm6, %v755_v40 }
 0x477   : > { %v762_v42 = vpop.permute.xlu0 %761 }
 0x478   : > { %v764_v44 = vmul.f32 %v762_v42, %v758_v41 }
 0x479   : > { %v1113_v61 = vld [vmem:[#allocation6] sm:$0xff] }
 0x4b6   : > { %v807_v45 = vpop.f32.mrb[12].mxu1 }
 0x4b7   : > { %v813_v46 = vadd.f32 %v807_v45, %v764_v44  ;;  %v1608_v47 = vpop.f32.mrb[13].mxu1 }
 0x4b8   : > { %v810_v48 = vpop.f32.mrb[14].mxu1 }
 0x4b9   : > { %814 = vst.msk [vmem:[#allocation7] sm:$0xff] %vm537_vm2, %v813_v46  ;;  %v1609_v49 = vpop.f32.mrb[15].mxu1 }
 0x4c0   : > { %v1115_v25 = vld [vmem:[#allocation7] sm:$0xff] }
 0x4e1   : > { %v897_v53 = vpop.xlane.xlu1 %896 }
 0x4e2   : > { %v898_v54 = vadd.f32 %v897_v53, %v894_v52 }
 0x4e4   : > { %899 = vst.msk [vmem:[#allocation6 + $0x8] sm:$0xff] %vm530_vm6, %v898_v54 }
 0x4e9   : > { %v1044_v58 = vpop.xlane.xlu1 %1043 }
 0x4ea   : > { %v1045_v59 = vadd.f32 %v1044_v58, %v1041_v57 }
 0x4eb   : > { %v1125_v60 = vld [vmem:[#allocation6 + $0x8] sm:$0xff] }
 0x4ec   : > { %1046 = vst.msk [vmem:[#allocation6 + $0x10] sm:$0xff] %vm530_vm6, %v1045_v59  ;;  %1813 = vrcp.f32 %v1125_v60 }
 0x4ed   : > { %1815 = vrcp.f32 %v1113_v61  ;;  %v905_v4 = vpop.permute.xlu1 %904 }
 0x4ee   : > { %v907_v5 = vmul.f32 %v905_v4, %v901_v3 }
 0x4f3   : > { %v1236_v62 = vld [vmem:[#allocation6 + $0x10] sm:$0xff] }
 0x4f4   : > { %1817 = vrcp.f32 %v1236_v62 }
 0x4f6   : > { %v1814_v63 = vpop.eup %1813 }
 0x4f7   : > { %1130 = vperm.xlu1 %1782, %v1814_v63   ;;  %v1816_v1 = vpop.eup %1815 }
 0x4fb   : > { %1051 = vperm.xlu1 %1782, %v1812_v55  }
 0x4fe   : > { %v1818_v2 = vpop.eup %1817 }
 0x4ff   : > { %1241 = vperm.xlu0 %1781, %v1818_v2   ;;  %1118 = vperm.xlu1 %1782, %v1816_v1  }
 0x528   : > { %v954_v6 = vpop.f32.mrb[16].mxu1 }
 0x529   : > { %v960_v7 = vadd.f32 %v954_v6, %v907_v5  ;;  %v1620_v8 = vpop.f32.mrb[17].mxu1 }
 0x52a   : > { %v957_v9 = vpop.f32.mrb[18].mxu1 }
 0x52b   : > { %961 = vst.msk [vmem:[#allocation7 + $0x8] sm:$0xff] %vm537_vm2, %v960_v7  ;;  %v1621_v10 = vpop.f32.mrb[19].mxu1 }
 0x530   : > { %v1101_v11 = vpop.f32.mrb[20].mxu1 }
 0x531   : > { %v1632_v12 = vpop.f32.mrb[21].mxu1 }
 0x532   : > { %v1104_v13 = vpop.f32.mrb[22].mxu1  ;;  %v1127_v16 = vld [vmem:[#allocation7 + $0x8] sm:$0xff] }
 0x533   : > { %v1633_v14 = vpop.f32.mrb[23].mxu1 }
 0x576   : > { %v1131_v15 = vpop.permute.xlu1 %1130 }
 0x577   : > { %v1133_v17 = vmul.f32 %v1131_v15, %v1127_v16 }
 0x579   : > { %v1134_v20 = vpack.c.bf16 %v1133_v17, %v1133_v17 }
 0x57a   : > { %v1052_v21 = vpop.permute.xlu1 %1051 }
 0x57b   : > { %v1054_v22 = vmul.f32 %v1052_v21, %v1048_v18  ;;  %1637 = vmatmul.mubr.msk.bf16.vlgmr.msra.gmra.mrb[12].mxu0 %vm537_vm2, %v1134_v20 }
 0x57c   : > { %1641 = vmatpush3.bf16.msra.mxu0 %v1799_v19  ;;  %1642 = vmatprep.mubr.msk.bf16.mxu0 %vm2127_vm0, %v2126_v0 }
 0x57d   : > { %v1107_v23 = vadd.f32 %v1101_v11, %v1054_v22  ;;  %1646 = vmatprep.subr.bf16.mxu0 %v2126_v0 }
 0x57e   : > { %v1119_v24 = vpop.permute.xlu1 %1118  ;;  %v1242_v30 = vpop.permute.xlu0 %1241 }
 0x57f   : > { %1108 = vst.msk [vmem:[#allocation7 + $0x10] sm:$0xff] %vm537_vm2, %v1107_v23  ;;  %v1121_v26 = vmul.f32 %v1119_v24, %v1115_v25 }
 0x581   : > { %v1122_v28 = vpack.c.bf16 %v1121_v26, %v1121_v26 }
 0x586   : > { %v1238_v29 = vld [vmem:[#allocation7 + $0x10] sm:$0xff] }
 0x587   : > { %1643 = vmatmul.mubr.msk.bf16.vlgmr.msra.gmra.mrb[12].mxu0 %vm537_vm2, %v1122_v28  ;;  %v1244_v31 = vmul.f32 %v1242_v30, %v1238_v29 }
 0x588   : > { %1647 = vmatpush3.bf16.msra.mxu0 %v1800_v27  ;;  %1648 = vmatprep.mubr.msk.bf16.mxu0 %vm2127_vm0, %v2126_v0 }
 0x589   : > { %v1245_v32 = vpack.c.bf16 %v1244_v31, %v1244_v31 }
 0x593   : > { %1649 = vmatmul.mubr.msk.bf16.vlgmr.msra.gmra.mrb[12].mxu0 %vm537_vm2, %v1245_v32 }
 0x666   : > { %v1292_v0 = vpop.f32.mrb[12].mxu0 }
 0x667   : > { %1299 = vst.msk [vmem:[%s452_s3] sm:$0xff] %vm483_vm1, %v1292_v0  ;;  %v1650_v33 = vpop.f32.mrb[13].mxu0 }
 0x668   : > { %v1295_v34 = vpop.f32.mrb[14].mxu0 }
 0x669   : > { %2034 = shalt.err (!%p2031_p11)
}
 0x66a   : > { %s2035_s1 = scalar_lea.hbm %s2621_s24, 128  ;;  %s2039_s16 = scalar_lea.hbm %s2739_s22, 256 }
 0x66b   : > { %p2036_p5 = scmp.ne.s32.totalorder %s2621_s24, %s2035_s1  ;;  %p2040_p0 = scmp.lt.u32.totalorder %s2621_s24, %s2739_s22 }
 0x66c   : > { %p2041_p4 = scmp.lt.u32.totalorder %s2039_s16, %s2035_s1  ;;  %p2043_p13 = scmp.lt.u32.totalorder %s2035_s1, %s2621_s24 }
 0x66d   : > { %p2037_p3 = pnand %p2036_p5, %p2740_p2 }
 0x66e   : > { %p2042_p10 = por %p2041_p4, %p2040_p0 }
 0x66f   : > { %p2038_p6 = pneg %p2037_p3 }
 0x670   : > { %p2044_p1 = por %p2043_p13, %p2042_p10 }
 0x672   : > { %p2045_p12 = pnand %p2044_p1, %p2038_p6 }
 0x674   : > { %2048 = shalt.err (!%p2045_p12)
}
 0x675   : > { %1682 = dma.vmem_to_hbm [thread:$0]  (%p2740_p2), %s2623_s10, 128, %s2621_s24, %s1301_s19   ;;  %v1651_v35 = vpop.f32.mrb[15].mxu0 }
 0x676 PF: > { %s2741_s23 = sld [smem:[#allocation26_spill]]  ;;  %s2742_s18 = sld [smem:[#allocation31_spill]] }
 0x677   : > { %s2743_s29 = sld [smem:[#allocation28_spill]] }
 0x67c   : > { %s1327_s30 = sand.u32 1, %s2741_s23   ;;  %p2744_p8 = scmp.ne.s32.totalorder %s2742_s18, 0 }
 0x67d   : > { %p2745_p9 = scmp.ge.s32.totalorder %s2743_s29, 2  ;;  %s1328_s20 = scalar_lea.sflag [#allocation10], %s1327_s30 }
 0x67f   : > { %p1708_p7 = pnand %p2745_p9, %p2744_p8 }
 0x681   : > { %2090 = dma.done.wait (!%p1708_p7), %s1328_s20, 128  }
 0x682   : > { %2092 = vsyncadd (!%p1708_p7), %s1328_s20, 4294967168  ;;  %s28_s29 = sadd.s32 1, %s2743_s29   ;;  %s2746_s21 = sld [smem:[#allocation30_spill]] }
 0x683   : > { %p25_p11 = scmp.ge.s32.totalorder %s28_s29, 4   ;;  %s2747_s27 = sld [smem:[#allocation27_spill]] }
 0x684   : > { %s2748_s28 = sld [smem:[#allocation29_spill]]  ;;  %s2749_s24 = smov %s2099_s25 }
 0x685   : > { %s2750_s25 = smov %s2103_s26  ;;  %27 = sbr.rel (!%p25_p11) target bundleno = 15 (0xf), region = 149 }
 0x688   : > { %s2751_s26 = smov %s2746_s21 }
 0x68c   :  { %1333 = vsyncpa [#allocation9], 1 }
 0x68d   :  { %1335 = vsyncpa [#allocation9 + $0x1], 1 }
 0x68e   :  { %1336 = vsyncpa [#allocation12], 1 }
 0x68f   :  { %1338 = vsyncpa [#allocation12 + $0x1], 1 }
 0x690   :  { %1339 = vsyncpa [#allocation15], 1 }
 0x691   :  { %1340 = vsyncpa [#allocation18], 1 }
 0x692   :  { %1341 = vsyncpa [#allocation10], 1 }
 0x693   :  { %1343 = vsyncpa [#allocation10 + $0x1], 1 }

</bundles_post_ra>
